<compile_context>
chip_gen: v7x
topology: tpu7x:2x2x1
jax: 0.10.0
libtpu: 0.0.40
codegen_flags: <defaults>
</compile_context>

<pallas_src>
import jax
import jax.numpy as jnp
from jax import lax
from jax.experimental import pallas as pl
from jax.experimental.pallas import tpu as pltpu


# ----------------------------------------------------------------------------
# Kernel 1: conv as a single fat matmul + bias, with fused BN-stat epilogue.
#   p_ref:  (1, R, K)  im2col patches (or flattened pixels for 1x1 convs)
#   w_ref:  (K, C)     weight, taps folded into K
#   b_ref:  (1, C)     bias (zeros for bias-free convs)
#   y_ref:  (1, R, C)  conv output
#   ssum_ref/ssq_ref: (1, 1, C) per-batch per-channel sum / sum-of-squares
# ----------------------------------------------------------------------------
def _matmul_bias_stats_kernel(p_ref, w_ref, b_ref, y_ref, ssum_ref, ssq_ref):
    acc = jnp.dot(p_ref[0], w_ref[...], preferred_element_type=jnp.float32)
    acc = acc + b_ref[...]
    y_ref[0] = acc
    ssum_ref[0] = jnp.sum(acc, axis=0, keepdims=True)
    ssq_ref[0] = jnp.sum(acc * acc, axis=0, keepdims=True)


# ----------------------------------------------------------------------------
# Kernel 2a: out = relu(a*scale_a + shift_a) + relu(b*scale_b + shift_b)
# (fuses two BatchNorm+ReLU branches and the FPN residual add)
# ----------------------------------------------------------------------------
def _dual_bn_relu_add_kernel(a_ref, sa_ref, ha_ref, b_ref, sb_ref, hb_ref,
                             o_ref):
    ya = jnp.maximum(a_ref[0] * sa_ref[...] + ha_ref[...], 0.0)
    yb = jnp.maximum(b_ref[0] * sb_ref[...] + hb_ref[...], 0.0)
    o_ref[0] = ya + yb


# ----------------------------------------------------------------------------
# Kernel 2b: out = relu(x*scale + shift)
# ----------------------------------------------------------------------------
def _bn_relu_kernel(x_ref, s_ref, h_ref, o_ref):
    o_ref[0] = jnp.maximum(x_ref[0] * s_ref[...] + h_ref[...], 0.0)


# ----------------------------------------------------------------------------
# pallas_call wrappers
# ----------------------------------------------------------------------------
def _matmul_bias_stats(rows, w_mat, bias):
    """rows: (N, R, K) f32; w_mat: (K, C); bias: (C,)."""
    N, R, K = rows.shape
    C = w_mat.shape[1]
    return pl.pallas_call(
        _matmul_bias_stats_kernel,
        out_shape=(jax.ShapeDtypeStruct((N, R, C), jnp.float32),
                   jax.ShapeDtypeStruct((N, 1, C), jnp.float32),
                   jax.ShapeDtypeStruct((N, 1, C), jnp.float32)),
        grid_spec=pltpu.PrefetchScalarGridSpec(
            num_scalar_prefetch=0,
            grid=(N,),
            in_specs=[
                pl.BlockSpec((1, R, K), lambda n: (n, 0, 0)),
                pl.BlockSpec((K, C), lambda n: (0, 0)),
                pl.BlockSpec((1, C), lambda n: (0, 0)),
            ],
            out_specs=[
                pl.BlockSpec((1, R, C), lambda n: (n, 0, 0)),
                pl.BlockSpec((1, 1, C), lambda n: (n, 0, 0)),
                pl.BlockSpec((1, 1, C), lambda n: (n, 0, 0)),
            ],
        ),
        compiler_params=pltpu.CompilerParams(
            dimension_semantics=("parallel",)),
    )(rows.astype(jnp.float32), w_mat.astype(jnp.float32),
      bias.reshape(1, C).astype(jnp.float32))


def _dual_bn_relu_add(a, sa, ha, b, sb, hb):
    N, R, C = a.shape
    return pl.pallas_call(
        _dual_bn_relu_add_kernel,
        out_shape=jax.ShapeDtypeStruct((N, R, C), jnp.float32),
        grid_spec=pltpu.PrefetchScalarGridSpec(
            num_scalar_prefetch=0,
            grid=(N,),
            in_specs=[
                pl.BlockSpec((1, R, C), lambda n: (n, 0, 0)),
                pl.BlockSpec((1, C), lambda n: (0, 0)),
                pl.BlockSpec((1, C), lambda n: (0, 0)),
                pl.BlockSpec((1, R, C), lambda n: (n, 0, 0)),
                pl.BlockSpec((1, C), lambda n: (0, 0)),
                pl.BlockSpec((1, C), lambda n: (0, 0)),
            ],
            out_specs=pl.BlockSpec((1, R, C), lambda n: (n, 0, 0)),
        ),
        compiler_params=pltpu.CompilerParams(
            dimension_semantics=("parallel",)),
    )(a, sa, ha, b, sb, hb)


def _bn_relu(x, scale, shift):
    N, R, C = x.shape
    return pl.pallas_call(
        _bn_relu_kernel,
        out_shape=jax.ShapeDtypeStruct((N, R, C), jnp.float32),
        grid_spec=pltpu.PrefetchScalarGridSpec(
            num_scalar_prefetch=0,
            grid=(N,),
            in_specs=[
                pl.BlockSpec((1, R, C), lambda n: (n, 0, 0)),
                pl.BlockSpec((1, C), lambda n: (0, 0)),
                pl.BlockSpec((1, C), lambda n: (0, 0)),
            ],
            out_specs=pl.BlockSpec((1, R, C), lambda n: (n, 0, 0)),
        ),
        compiler_params=pltpu.CompilerParams(
            dimension_semantics=("parallel",)),
    )(x, scale, shift)


# ----------------------------------------------------------------------------
# Wrapper-side glue (layout, im2col fold, BN stat finalize)
# ----------------------------------------------------------------------------
def _im2col_3x3_s2p1(x_nhwc):
    """3x3, stride 2, pad 1 patches: (N,H,W,C) -> (N, OH*OW, 9*C)."""
    N, H, W, C = x_nhwc.shape
    OH, OW = H // 2, W // 2
    xp = jnp.pad(x_nhwc, ((0, 0), (1, 1), (1, 1), (0, 0)))
    cols = [xp[:, kh:kh + 2 * OH:2, kw:kw + 2 * OW:2, :]
            for kh in range(3) for kw in range(3)]
    patches = jnp.concatenate(cols, axis=-1)              # (N, OH, OW, 9C)
    return patches.reshape(N, OH * OW, 9 * C), (OH, OW)


def _w3x3_to_mat(w):  # (Cout, Cin, 3, 3) -> (9*Cin, Cout), tap order kh,kw,ci
    return jnp.transpose(w, (2, 3, 1, 0)).reshape(-1, w.shape[0])


def _w1x1_to_mat(w):  # (Cout, Cin, 1, 1) -> (Cin, Cout)
    return jnp.transpose(w[:, :, 0, 0], (1, 0))


def _bn_scale_shift(ssum, ssq, gamma, beta, count, eps=1e-5):
    """Fold batch-stats BN into per-channel scale/shift (biased variance)."""
    s1 = jnp.sum(ssum, axis=(0, 1))
    s2 = jnp.sum(ssq, axis=(0, 1))
    mean = s1 / count
    var = s2 / count - mean * mean
    scale = gamma * lax.rsqrt(var + eps)
    shift = beta - mean * scale
    return (scale.reshape(1, -1).astype(jnp.float32),
            shift.reshape(1, -1).astype(jnp.float32))


def fpn_forward_pallas(x0, x1, x2, p):
    """x0/x1/x2 in NCHW (PyTorch layout); returns NCHW."""
    N = x0.shape[0]
    f32 = jnp.float32
    x0h = jnp.transpose(x0, (0, 2, 3, 1)).astype(f32)
    x1h = jnp.transpose(x1, (0, 2, 3, 1)).astype(f32)
    x2h = jnp.transpose(x2, (0, 2, 3, 1)).astype(f32)

    C1 = p["w1"].shape[0]      # 32 * expansion
    C2 = p["w2"].shape[0]      # 64 * expansion

    # conv1 (3x3 s2, no bias) + bn1 stats
    pa1, (oh1, ow1) = _im2col_3x3_s2p1(x0h)
    y1, s1, q1 = _matmul_bias_stats(pa1, _w3x3_to_mat(p["w1"]),
                                    jnp.zeros((C1,), f32))
    sc1, sh1 = _bn_scale_shift(s1, q1, p["g1"], p["b1"], N * oh1 * ow1)

    # conv21 (1x1, bias) + bn21 stats
    r21 = x1h.reshape(N, -1, x1h.shape[-1])
    y21, s21, q21 = _matmul_bias_stats(r21, _w1x1_to_mat(p["w21"]),
                                       p["bias21"])
    sc21, sh21 = _bn_scale_shift(s21, q21, p["g21"], p["b21"],
                                 N * r21.shape[1])

    # fpn1 = relu(bn21(conv21(x1))) + relu(bn1(conv1(x0)))   [fused]
    fpn1 = _dual_bn_relu_add(y21, sc21, sh21, y1, sc1, sh1)   # (N, oh1*ow1, C1)

    # conv2 (3x3 s2, no bias) on fpn1 + bn2 stats
    fpn1_img = fpn1.reshape(N, oh1, ow1, C1)
    pa2, (oh2, ow2) = _im2col_3x3_s2p1(fpn1_img)
    y2, s2, q2 = _matmul_bias_stats(pa2, _w3x3_to_mat(p["w2"]),
                                    jnp.zeros((C2,), f32))
    sc2, sh2 = _bn_scale_shift(s2, q2, p["g2"], p["b2"], N * oh2 * ow2)

    # conv31 (1x1, bias) on x2 + bn31 stats
    r31 = x2h.reshape(N, -1, x2h.shape[-1])
    y31, s31, q31 = _matmul_bias_stats(r31, _w1x1_to_mat(p["w31"]),
                                       p["bias31"])
    sc31, sh31 = _bn_scale_shift(s31, q31, p["g31"], p["b31"],
                                 N * r31.shape[1])

    # sv = relu(bn2(conv2(fpn1))) + relu(bn31(conv31(x2)))   [fused]
    sv = _dual_bn_relu_add(y2, sc2, sh2, y31, sc31, sh31)     # (N, oh2*ow2, C2)

    # convf (1x1, bias) + bnf + relu
    yf, sf, qf = _matmul_bias_stats(sv, _w1x1_to_mat(p["wf"]), p["biasf"])
    scf, shf = _bn_scale_shift(sf, qf, p["gf"], p["bf"], N * oh2 * ow2)
    out = _bn_relu(yf, scf, shf)                              # (N, oh2*ow2, C2)

    # TODO(synk): self.bn_layer (self._make_layer(block, 128, layers, stride=2))
    # depends on the caller-supplied ResNet `block` class, which is not defined
    # in the spec, so that residual stack is not translated here.

    out = out.reshape(N, oh2, ow2, C2)
    return jnp.transpose(out, (0, 3, 1, 2))


fpn_forward_pallas_jit = jax.jit(fpn_forward_pallas)


# ----------------------------------------------------------------------------
# Pure-JAX reference (in-script validation only)
# ----------------------------------------------------------------------------
def _reference(x0, x1, x2, p):
    def conv(xh, w, b, stride, pad):
        wh = jnp.transpose(w, (2, 3, 1, 0))
        y = lax.conv_general_dilated(
            xh, wh, (stride, stride), ((pad, pad), (pad, pad)),
            dimension_numbers=("NHWC", "HWIO", "NHWC"))
        if b is not None:
            y = y + b.reshape(1, 1, 1, -1)
        return y

    def bn_relu(y, g, bta):
        mean = jnp.mean(y, axis=(0, 1, 2), keepdims=True)
        var = jnp.mean((y - mean) ** 2, axis=(0, 1, 2), keepdims=True)
        yh = (y - mean) * lax.rsqrt(var + 1e-5) * g.reshape(1, 1, 1, -1) \
            + bta.reshape(1, 1, 1, -1)
        return jnp.maximum(yh, 0.0)

    x0h = jnp.transpose(x0, (0, 2, 3, 1)).astype(jnp.float32)
    x1h = jnp.transpose(x1, (0, 2, 3, 1)).astype(jnp.float32)
    x2h = jnp.transpose(x2, (0, 2, 3, 1)).astype(jnp.float32)

    fpn0 = bn_relu(conv(x0h, p["w1"], None, 2, 1), p["g1"], p["b1"])
    fpn1 = bn_relu(conv(x1h, p["w21"], p["bias21"], 1, 0),
                   p["g21"], p["b21"]) + fpn0
    sv = bn_relu(conv(fpn1, p["w2"], None, 2, 1), p["g2"], p["b2"]) \
        + bn_relu(conv(x2h, p["w31"], p["bias31"], 1, 0), p["g31"], p["b31"])
    sv = bn_relu(conv(sv, p["wf"], p["biasf"], 1, 0), p["gf"], p["bf"])
    return jnp.transpose(sv, (0, 3, 1, 2))


if __name__ == "__main__":
    expansion = 1          # BasicBlock-style expansion -> small demo widths
    N = 2
    C0, C1, C2 = 16 * expansion, 32 * expansion, 64 * expansion
    H0 = W0 = 16

    key = jax.random.PRNGKey(0)
    ks = jax.random.split(key, 11)

    def kaiming(k, cout, cin, kh, kw):          # mode='fan_out', relu gain
        fan_out = cout * kh * kw
        return (jax.random.normal(k, (cout, cin, kh, kw), jnp.float32)
                * jnp.sqrt(2.0 / fan_out))

    x0 = jax.random.normal(ks[0], (N, C0, H0, W0), jnp.float32)
    x1 = jax.random.normal(ks[1], (N, C1, H0 // 2, W0 // 2), jnp.float32)
    x2 = jax.random.normal(ks[2], (N, C2, H0 // 4, W0 // 4), jnp.float32)

    params = dict(
        w1=kaiming(ks[3], C1, C0, 3, 3),
        g1=jnp.ones((C1,), jnp.float32), b1=jnp.zeros((C1,), jnp.float32),
        w21=kaiming(ks[4], C1, C1, 1, 1),
        bias21=0.05 * jax.random.normal(ks[5], (C1,), jnp.float32),
        g21=jnp.ones((C1,), jnp.float32), b21=jnp.zeros((C1,), jnp.float32),
        w2=kaiming(ks[6], C2, C1, 3, 3),
        g2=jnp.ones((C2,), jnp.float32), b2=jnp.zeros((C2,), jnp.float32),
        w31=kaiming(ks[7], C2, C2, 1, 1),
        bias31=0.05 * jax.random.normal(ks[8], (C2,), jnp.float32),
        g31=jnp.ones((C2,), jnp.float32), b31=jnp.zeros((C2,), jnp.float32),
        wf=kaiming(ks[9], C2, C2, 1, 1),
        biasf=0.05 * jax.random.normal(ks[10], (C2,), jnp.float32),
        gf=jnp.ones((C2,), jnp.float32), bf=jnp.zeros((C2,), jnp.float32),
    )

    out = jax.block_until_ready(fpn_forward_pallas_jit(x0, x1, x2, params))
    ref = jax.block_until_ready(_reference(x0, x1, x2, params))

    assert out.shape == (N, C2, H0 // 4, W0 // 4), out.shape
    max_err = float(jnp.max(jnp.abs(out - ref)))
    assert max_err < 1e-3, max_err

    print("KERNEL_OK")
</pallas_src>

<mosaic_0001>
module attributes {stable_mosaic.version = 11 : i64} {
  func.func @_matmul_bias_stats_kernel(%arg0: i32, %arg1: memref<1x64x32xf32, #tpu.memory_space<vmem>>, %arg2: memref<32x32xf32, #tpu.memory_space<vmem>>, %arg3: memref<1x32xf32, #tpu.memory_space<vmem>>, %arg4: memref<1x64x32xf32, #tpu.memory_space<vmem>>, %arg5: memref<1x1x32xf32, #tpu.memory_space<vmem>>, %arg6: memref<1x1x32xf32, #tpu.memory_space<vmem>>) attributes {dimension_semantics = [#tpu.dimension_semantics<parallel>], iteration_bounds = array<i64: 2>, scalar_prefetch = 0 : i64, scratch_operands = 0 : i64, tpu.core_type = #tpu.core_type<tc>, window_params = [{transform_indices = @transform_0, window_bounds = array<i64: 1, 64, 32>}, {pipeline_mode = #tpu.pipeline_mode<synchronous>, transform_indices = @transform_1, window_bounds = array<i64: 32, 32>}, {pipeline_mode = #tpu.pipeline_mode<synchronous>, transform_indices = @transform_2, window_bounds = array<i64: 1, 32>}, {transform_indices = @transform_3, window_bounds = array<i64: 1, 64, 32>}, {transform_indices = @transform_4, window_bounds = array<i64: 1, 1, 32>}, {transform_indices = @transform_5, window_bounds = array<i64: 1, 1, 32>}]} {
    %c0 = arith.constant 0 : index
    %c0_0 = arith.constant 0 : index
    %c0_1 = arith.constant 0 : index
    %0 = vector.load %arg1[%c0, %c0_0, %c0_1] : memref<1x64x32xf32, #tpu.memory_space<vmem>>, vector<1x64x32xf32>
    %1 = vector.shape_cast %0 : vector<1x64x32xf32> to vector<64x32xf32>
    %c0_2 = arith.constant 0 : index
    %c0_3 = arith.constant 0 : index
    %2 = vector.load %arg2[%c0_2, %c0_3] : memref<32x32xf32, #tpu.memory_space<vmem>>, vector<32x32xf32>
    %cst = arith.constant dense<0.000000e+00> : vector<64x32xf32>
    %3 = tpu.matmul %1, %2, %cst {dimension_numbers = #tpu.dot_dimension_numbers<[1], [0], [0], [1], [0, 0, 1, 1], [], []>} : vector<64x32xf32>, vector<32x32xf32>, vector<64x32xf32> -> vector<64x32xf32>
    %c0_4 = arith.constant 0 : index
    %c0_5 = arith.constant 0 : index
    %4 = vector.load %arg3[%c0_4, %c0_5] : memref<1x32xf32, #tpu.memory_space<vmem>>, vector<1x32xf32>
    %5 = vector.broadcast %4 : vector<1x32xf32> to vector<64x32xf32>
    %6 = arith.addf %3, %5 : vector<64x32xf32>
    %c0_6 = arith.constant 0 : index
    %c0_7 = arith.constant 0 : index
    %c0_8 = arith.constant 0 : index
    %7 = vector.load %arg4[%c0_6, %c0_7, %c0_8] : memref<1x64x32xf32, #tpu.memory_space<vmem>>, vector<1x64x32xf32>
    %8 = vector.shape_cast %7 : vector<1x64x32xf32> to vector<64x32xf32>
    %9 = vector.shape_cast %6 : vector<64x32xf32> to vector<1x64x32xf32>
    tpu.vector_store %arg4[%c0_6, %c0_7, %c0_8], %9 {strides = array<i32>} : memref<1x64x32xf32, #tpu.memory_space<vmem>>, vector<1x64x32xf32>,
    %cst_9 = arith.constant dense<0.000000e+00> : vector<32xf32>
    %10 = vector.multi_reduction <add>, %6, %cst_9 [0] : vector<64x32xf32> to vector<32xf32>
    %11 = vector.shape_cast %10 : vector<32xf32> to vector<1x32xf32>
    %c0_10 = arith.constant 0 : index
    %c0_11 = arith.constant 0 : index
    %c0_12 = arith.constant 0 : index
    %12 = vector.load %arg5[%c0_10, %c0_11, %c0_12] : memref<1x1x32xf32, #tpu.memory_space<vmem>>, vector<1x1x32xf32>
    %13 = vector.shape_cast %12 : vector<1x1x32xf32> to vector<1x32xf32>
    %14 = vector.shape_cast %11 : vector<1x32xf32> to vector<1x1x32xf32>
    tpu.vector_store %arg5[%c0_10, %c0_11, %c0_12], %14 {strides = array<i32>} : memref<1x1x32xf32, #tpu.memory_space<vmem>>, vector<1x1x32xf32>,
    %15 = arith.mulf %6, %6 : vector<64x32xf32>
    %cst_13 = arith.constant dense<0.000000e+00> : vector<32xf32>
    %16 = vector.multi_reduction <add>, %15, %cst_13 [0] : vector<64x32xf32> to vector<32xf32>
    %17 = vector.shape_cast %16 : vector<32xf32> to vector<1x32xf32>
    %c0_14 = arith.constant 0 : index
    %c0_15 = arith.constant 0 : index
    %c0_16 = arith.constant 0 : index
    %18 = vector.load %arg6[%c0_14, %c0_15, %c0_16] : memref<1x1x32xf32, #tpu.memory_space<vmem>>, vector<1x1x32xf32>
    %19 = vector.shape_cast %18 : vector<1x1x32xf32> to vector<1x32xf32>
    %20 = vector.shape_cast %17 : vector<1x32xf32> to vector<1x1x32xf32>
    tpu.vector_store %arg6[%c0_14, %c0_15, %c0_16], %20 {strides = array<i32>} : memref<1x1x32xf32, #tpu.memory_space<vmem>>, vector<1x1x32xf32>,
    return
  }
  func.func @transform_0(%arg0: i32) -> (i32, i32, i32) {
    %c0_i32 = arith.constant 0 : i32
    %c0_i32_0 = arith.constant 0 : i32
    %c0_i32_1 = arith.constant 0 : i32
    return %arg0, %c0_i32, %c0_i32_0 : i32, i32, i32
  }
  func.func @transform_1(%arg0: i32) -> (i32, i32) {
    %c0_i32 = arith.constant 0 : i32
    %c0_i32_0 = arith.constant 0 : i32
    %c0_i32_1 = arith.constant 0 : i32
    return %c0_i32, %c0_i32_0 : i32, i32
  }
  func.func @transform_2(%arg0: i32) -> (i32, i32) {
    %c0_i32 = arith.constant 0 : i32
    %c0_i32_0 = arith.constant 0 : i32
    %c0_i32_1 = arith.constant 0 : i32
    return %c0_i32, %c0_i32_0 : i32, i32
  }
  func.func @transform_3(%arg0: i32) -> (i32, i32, i32) {
    %c0_i32 = arith.constant 0 : i32
    %c0_i32_0 = arith.constant 0 : i32
    %c0_i32_1 = arith.constant 0 : i32
    return %arg0, %c0_i32, %c0_i32_0 : i32, i32, i32
  }
  func.func @transform_4(%arg0: i32) -> (i32, i32, i32) {
    %c0_i32 = arith.constant 0 : i32
    %c0_i32_0 = arith.constant 0 : i32
    %c0_i32_1 = arith.constant 0 : i32
    return %arg0, %c0_i32, %c0_i32_0 : i32, i32, i32
  }
  func.func @transform_5(%arg0: i32) -> (i32, i32, i32) {
    %c0_i32 = arith.constant 0 : i32
    %c0_i32_0 = arith.constant 0 : i32
    %c0_i32_1 = arith.constant 0 : i32
    return %arg0, %c0_i32, %c0_i32_0 : i32, i32, i32
  }
}

module attributes {stable_mosaic.version = 11 : i64} {
  func.func @_matmul_bias_stats_kernel(%arg0: i32, %arg1: memref<1x64x144xf32, #tpu.memory_space<vmem>>, %arg2: memref<144x32xf32, #tpu.memory_space<vmem>>, %arg3: memref<1x32xf32, #tpu.memory_space<vmem>>, %arg4: memref<1x64x32xf32, #tpu.memory_space<vmem>>, %arg5: memref<1x1x32xf32, #tpu.memory_space<vmem>>, %arg6: memref<1x1x32xf32, #tpu.memory_space<vmem>>) attributes {dimension_semantics = [#tpu.dimension_semantics<parallel>], iteration_bounds = array<i64: 2>, scalar_prefetch = 0 : i64, scratch_operands = 0 : i64, tpu.core_type = #tpu.core_type<tc>, window_params = [{transform_indices = @transform_0, window_bounds = array<i64: 1, 64, 144>}, {pipeline_mode = #tpu.pipeline_mode<synchronous>, transform_indices = @transform_1, window_bounds = array<i64: 144, 32>}, {pipeline_mode = #tpu.pipeline_mode<synchronous>, transform_indices = @transform_2, window_bounds = array<i64: 1, 32>}, {transform_indices = @transform_3, window_bounds = array<i64: 1, 64, 32>}, {transform_indices = @transform_4, window_bounds = array<i64: 1, 1, 32>}, {transform_indices = @transform_5, window_bounds = array<i64: 1, 1, 32>}]} {
    %c0 = arith.constant 0 : index
    %c0_0 = arith.constant 0 : index
    %c0_1 = arith.constant 0 : index
    %0 = vector.load %arg1[%c0, %c0_0, %c0_1] : memref<1x64x144xf32, #tpu.memory_space<vmem>>, vector<1x64x144xf32>
    %1 = vector.shape_cast %0 : vector<1x64x144xf32> to vector<64x144xf32>
    %c0_2 = arith.constant 0 : index
    %c0_3 = arith.constant 0 : index
    %2 = vector.load %arg2[%c0_2, %c0_3] : memref<144x32xf32, #tpu.memory_space<vmem>>, vector<144x32xf32>
    %cst = arith.constant dense<0.000000e+00> : vector<64x32xf32>
    %3 = tpu.matmul %1, %2, %cst {dimension_numbers = #tpu.dot_dimension_numbers<[1], [0], [0], [1], [0, 0, 1, 1], [], []>} : vector<64x144xf32>, vector<144x32xf32>, vector<64x32xf32> -> vector<64x32xf32>
    %c0_4 = arith.constant 0 : index
    %c0_5 = arith.constant 0 : index
    %4 = vector.load %arg3[%c0_4, %c0_5] : memref<1x32xf32, #tpu.memory_space<vmem>>, vector<1x32xf32>
    %5 = vector.broadcast %4 : vector<1x32xf32> to vector<64x32xf32>
    %6 = arith.addf %3, %5 : vector<64x32xf32>
    %c0_6 = arith.constant 0 : index
    %c0_7 = arith.constant 0 : index
    %c0_8 = arith.constant 0 : index
    %7 = vector.load %arg4[%c0_6, %c0_7, %c0_8] : memref<1x64x32xf32, #tpu.memory_space<vmem>>, vector<1x64x32xf32>
    %8 = vector.shape_cast %7 : vector<1x64x32xf32> to vector<64x32xf32>
    %9 = vector.shape_cast %6 : vector<64x32xf32> to vector<1x64x32xf32>
    tpu.vector_store %arg4[%c0_6, %c0_7, %c0_8], %9 {strides = array<i32>} : memref<1x64x32xf32, #tpu.memory_space<vmem>>, vector<1x64x32xf32>,
    %cst_9 = arith.constant dense<0.000000e+00> : vector<32xf32>
    %10 = vector.multi_reduction <add>, %6, %cst_9 [0] : vector<64x32xf32> to vector<32xf32>
    %11 = vector.shape_cast %10 : vector<32xf32> to vector<1x32xf32>
    %c0_10 = arith.constant 0 : index
    %c0_11 = arith.constant 0 : index
    %c0_12 = arith.constant 0 : index
    %12 = vector.load %arg5[%c0_10, %c0_11, %c0_12] : memref<1x1x32xf32, #tpu.memory_space<vmem>>, vector<1x1x32xf32>
    %13 = vector.shape_cast %12 : vector<1x1x32xf32> to vector<1x32xf32>
    %14 = vector.shape_cast %11 : vector<1x32xf32> to vector<1x1x32xf32>
    tpu.vector_store %arg5[%c0_10, %c0_11, %c0_12], %14 {strides = array<i32>} : memref<1x1x32xf32, #tpu.memory_space<vmem>>, vector<1x1x32xf32>,
    %15 = arith.mulf %6, %6 : vector<64x32xf32>
    %cst_13 = arith.constant dense<0.000000e+00> : vector<32xf32>
    %16 = vector.multi_reduction <add>, %15, %cst_13 [0] : vector<64x32xf32> to vector<32xf32>
    %17 = vector.shape_cast %16 : vector<32xf32> to vector<1x32xf32>
    %c0_14 = arith.constant 0 : index
    %c0_15 = arith.constant 0 : index
    %c0_16 = arith.constant 0 : index
    %18 = vector.load %arg6[%c0_14, %c0_15, %c0_16] : memref<1x1x32xf32, #tpu.memory_space<vmem>>, vector<1x1x32xf32>
    %19 = vector.shape_cast %18 : vector<1x1x32xf32> to vector<1x32xf32>
    %20 = vector.shape_cast %17 : vector<1x32xf32> to vector<1x1x32xf32>
    tpu.vector_store %arg6[%c0_14, %c0_15, %c0_16], %20 {strides = array<i32>} : memref<1x1x32xf32, #tpu.memory_space<vmem>>, vector<1x1x32xf32>,
    return
  }
  func.func @transform_0(%arg0: i32) -> (i32, i32, i32) {
    %c0_i32 = arith.constant 0 : i32
    %c0_i32_0 = arith.constant 0 : i32
    %c0_i32_1 = arith.constant 0 : i32
    return %arg0, %c0_i32, %c0_i32_0 : i32, i32, i32
  }
  func.func @transform_1(%arg0: i32) -> (i32, i32) {
    %c0_i32 = arith.constant 0 : i32
    %c0_i32_0 = arith.constant 0 : i32
    %c0_i32_1 = arith.constant 0 : i32
    return %c0_i32, %c0_i32_0 : i32, i32
  }
  func.func @transform_2(%arg0: i32) -> (i32, i32) {
    %c0_i32 = arith.constant 0 : i32
    %c0_i32_0 = arith.constant 0 : i32
    %c0_i32_1 = arith.constant 0 : i32
    return %c0_i32, %c0_i32_0 : i32, i32
  }
  func.func @transform_3(%arg0: i32) -> (i32, i32, i32) {
    %c0_i32 = arith.constant 0 : i32
    %c0_i32_0 = arith.constant 0 : i32
    %c0_i32_1 = arith.constant 0 : i32
    return %arg0, %c0_i32, %c0_i32_0 : i32, i32, i32
  }
  func.func @transform_4(%arg0: i32) -> (i32, i32, i32) {
    %c0_i32 = arith.constant 0 : i32
    %c0_i32_0 = arith.constant 0 : i32
    %c0_i32_1 = arith.constant 0 : i32
    return %arg0, %c0_i32, %c0_i32_0 : i32, i32, i32
  }
  func.func @transform_5(%arg0: i32) -> (i32, i32, i32) {
    %c0_i32 = arith.constant 0 : i32
    %c0_i32_0 = arith.constant 0 : i32
    %c0_i32_1 = arith.constant 0 : i32
    return %arg0, %c0_i32, %c0_i32_0 : i32, i32, i32
  }
}

module attributes {stable_mosaic.version = 11 : i64} {
  func.func @_dual_bn_relu_add_kernel(%arg0: i32, %arg1: memref<1x64x32xf32, #tpu.memory_space<vmem>>, %arg2: memref<1x32xf32, #tpu.memory_space<vmem>>, %arg3: memref<1x32xf32, #tpu.memory_space<vmem>>, %arg4: memref<1x64x32xf32, #tpu.memory_space<vmem>>, %arg5: memref<1x32xf32, #tpu.memory_space<vmem>>, %arg6: memref<1x32xf32, #tpu.memory_space<vmem>>, %arg7: memref<1x64x32xf32, #tpu.memory_space<vmem>>) attributes {dimension_semantics = [#tpu.dimension_semantics<parallel>], iteration_bounds = array<i64: 2>, scalar_prefetch = 0 : i64, scratch_operands = 0 : i64, tpu.core_type = #tpu.core_type<tc>, window_params = [{transform_indices = @transform_0, window_bounds = array<i64: 1, 64, 32>}, {pipeline_mode = #tpu.pipeline_mode<synchronous>, transform_indices = @transform_1, window_bounds = array<i64: 1, 32>}, {pipeline_mode = #tpu.pipeline_mode<synchronous>, transform_indices = @transform_2, window_bounds = array<i64: 1, 32>}, {transform_indices = @transform_3, window_bounds = array<i64: 1, 64, 32>}, {pipeline_mode = #tpu.pipeline_mode<synchronous>, transform_indices = @transform_4, window_bounds = array<i64: 1, 32>}, {pipeline_mode = #tpu.pipeline_mode<synchronous>, transform_indices = @transform_5, window_bounds = array<i64: 1, 32>}, {transform_indices = @transform_6, window_bounds = array<i64: 1, 64, 32>}]} {
    %c0 = arith.constant 0 : index
    %c0_0 = arith.constant 0 : index
    %c0_1 = arith.constant 0 : index
    %0 = vector.load %arg1[%c0, %c0_0, %c0_1] : memref<1x64x32xf32, #tpu.memory_space<vmem>>, vector<1x64x32xf32>
    %1 = vector.shape_cast %0 : vector<1x64x32xf32> to vector<64x32xf32>
    %c0_2 = arith.constant 0 : index
    %c0_3 = arith.constant 0 : index
    %2 = vector.load %arg2[%c0_2, %c0_3] : memref<1x32xf32, #tpu.memory_space<vmem>>, vector<1x32xf32>
    %3 = vector.broadcast %2 : vector<1x32xf32> to vector<64x32xf32>
    %4 = arith.mulf %1, %3 : vector<64x32xf32>
    %c0_4 = arith.constant 0 : index
    %c0_5 = arith.constant 0 : index
    %5 = vector.load %arg3[%c0_4, %c0_5] : memref<1x32xf32, #tpu.memory_space<vmem>>, vector<1x32xf32>
    %6 = vector.broadcast %5 : vector<1x32xf32> to vector<64x32xf32>
    %7 = arith.addf %4, %6 : vector<64x32xf32>
    %cst = arith.constant 0.000000e+00 : f32
    %8 = vector.broadcast %cst : f32 to vector<64x32xf32>
    %9 = arith.maximumf %7, %8 : vector<64x32xf32>
    %c0_6 = arith.constant 0 : index
    %c0_7 = arith.constant 0 : index
    %c0_8 = arith.constant 0 : index
    %10 = vector.load %arg4[%c0_6, %c0_7, %c0_8] : memref<1x64x32xf32, #tpu.memory_space<vmem>>, vector<1x64x32xf32>
    %11 = vector.shape_cast %10 : vector<1x64x32xf32> to vector<64x32xf32>
    %c0_9 = arith.constant 0 : index
    %c0_10 = arith.constant 0 : index
    %12 = vector.load %arg5[%c0_9, %c0_10] : memref<1x32xf32, #tpu.memory_space<vmem>>, vector<1x32xf32>
    %13 = vector.broadcast %12 : vector<1x32xf32> to vector<64x32xf32>
    %14 = arith.mulf %11, %13 : vector<64x32xf32>
    %c0_11 = arith.constant 0 : index
    %c0_12 = arith.constant 0 : index
    %15 = vector.load %arg6[%c0_11, %c0_12] : memref<1x32xf32, #tpu.memory_space<vmem>>, vector<1x32xf32>
    %16 = vector.broadcast %15 : vector<1x32xf32> to vector<64x32xf32>
    %17 = arith.addf %14, %16 : vector<64x32xf32>
    %cst_13 = arith.constant 0.000000e+00 : f32
    %18 = vector.broadcast %cst_13 : f32 to vector<64x32xf32>
    %19 = arith.maximumf %17, %18 : vector<64x32xf32>
    %20 = arith.addf %9, %19 : vector<64x32xf32>
    %c0_14 = arith.constant 0 : index
    %c0_15 = arith.constant 0 : index
    %c0_16 = arith.constant 0 : index
    %21 = vector.load %arg7[%c0_14, %c0_15, %c0_16] : memref<1x64x32xf32, #tpu.memory_space<vmem>>, vector<1x64x32xf32>
    %22 = vector.shape_cast %21 : vector<1x64x32xf32> to vector<64x32xf32>
    %23 = vector.shape_cast %20 : vector<64x32xf32> to vector<1x64x32xf32>
    tpu.vector_store %arg7[%c0_14, %c0_15, %c0_16], %23 {strides = array<i32>} : memref<1x64x32xf32, #tpu.memory_space<vmem>>, vector<1x64x32xf32>,
    return
  }
  func.func @transform_0(%arg0: i32) -> (i32, i32, i32) {
    %c0_i32 = arith.constant 0 : i32
    %c0_i32_0 = arith.constant 0 : i32
    %c0_i32_1 = arith.constant 0 : i32
    return %arg0, %c0_i32, %c0_i32_0 : i32, i32, i32
  }
  func.func @transform_1(%arg0: i32) -> (i32, i32) {
    %c0_i32 = arith.constant 0 : i32
    %c0_i32_0 = arith.constant 0 : i32
    %c0_i32_1 = arith.constant 0 : i32
    return %c0_i32, %c0_i32_0 : i32, i32
  }
  func.func @transform_2(%arg0: i32) -> (i32, i32) {
    %c0_i32 = arith.constant 0 : i32
    %c0_i32_0 = arith.constant 0 : i32
    %c0_i32_1 = arith.constant 0 : i32
    return %c0_i32, %c0_i32_0 : i32, i32
  }
  func.func @transform_3(%arg0: i32) -> (i32, i32, i32) {
    %c0_i32 = arith.constant 0 : i32
    %c0_i32_0 = arith.constant 0 : i32
    %c0_i32_1 = arith.constant 0 : i32
    return %arg0, %c0_i32, %c0_i32_0 : i32, i32, i32
  }
  func.func @transform_4(%arg0: i32) -> (i32, i32) {
    %c0_i32 = arith.constant 0 : i32
    %c0_i32_0 = arith.constant 0 : i32
    %c0_i32_1 = arith.constant 0 : i32
    return %c0_i32, %c0_i32_0 : i32, i32
  }
  func.func @transform_5(%arg0: i32) -> (i32, i32) {
    %c0_i32 = arith.constant 0 : i32
    %c0_i32_0 = arith.constant 0 : i32
    %c0_i32_1 = arith.constant 0 : i32
    return %c0_i32, %c0_i32_0 : i32, i32
  }
  func.func @transform_6(%arg0: i32) -> (i32, i32, i32) {
    %c0_i32 = arith.constant 0 : i32
    %c0_i32_0 = arith.constant 0 : i32
    %c0_i32_1 = arith.constant 0 : i32
    return %arg0, %c0_i32, %c0_i32_0 : i32, i32, i32
  }
}

module attributes {stable_mosaic.version = 11 : i64} {
  func.func @_matmul_bias_stats_kernel(%arg0: i32, %arg1: memref<1x16x288xf32, #tpu.memory_space<vmem>>, %arg2: memref<288x64xf32, #tpu.memory_space<vmem>>, %arg3: memref<1x64xf32, #tpu.memory_space<vmem>>, %arg4: memref<1x16x64xf32, #tpu.memory_space<vmem>>, %arg5: memref<1x1x64xf32, #tpu.memory_space<vmem>>, %arg6: memref<1x1x64xf32, #tpu.memory_space<vmem>>) attributes {dimension_semantics = [#tpu.dimension_semantics<parallel>], iteration_bounds = array<i64: 2>, scalar_prefetch = 0 : i64, scratch_operands = 0 : i64, tpu.core_type = #tpu.core_type<tc>, window_params = [{transform_indices = @transform_0, window_bounds = array<i64: 1, 16, 288>}, {pipeline_mode = #tpu.pipeline_mode<synchronous>, transform_indices = @transform_1, window_bounds = array<i64: 288, 64>}, {pipeline_mode = #tpu.pipeline_mode<synchronous>, transform_indices = @transform_2, window_bounds = array<i64: 1, 64>}, {transform_indices = @transform_3, window_bounds = array<i64: 1, 16, 64>}, {transform_indices = @transform_4, window_bounds = array<i64: 1, 1, 64>}, {transform_indices = @transform_5, window_bounds = array<i64: 1, 1, 64>}]} {
    %c0 = arith.constant 0 : index
    %c0_0 = arith.constant 0 : index
    %c0_1 = arith.constant 0 : index
    %0 = vector.load %arg1[%c0, %c0_0, %c0_1] : memref<1x16x288xf32, #tpu.memory_space<vmem>>, vector<1x16x288xf32>
    %1 = vector.shape_cast %0 : vector<1x16x288xf32> to vector<16x288xf32>
    %c0_2 = arith.constant 0 : index
    %c0_3 = arith.constant 0 : index
    %2 = vector.load %arg2[%c0_2, %c0_3] : memref<288x64xf32, #tpu.memory_space<vmem>>, vector<288x64xf32>
    %cst = arith.constant dense<0.000000e+00> : vector<16x64xf32>
    %3 = tpu.matmul %1, %2, %cst {dimension_numbers = #tpu.dot_dimension_numbers<[1], [0], [0], [1], [0, 0, 1, 1], [], []>} : vector<16x288xf32>, vector<288x64xf32>, vector<16x64xf32> -> vector<16x64xf32>
    %c0_4 = arith.constant 0 : index
    %c0_5 = arith.constant 0 : index
    %4 = vector.load %arg3[%c0_4, %c0_5] : memref<1x64xf32, #tpu.memory_space<vmem>>, vector<1x64xf32>
    %5 = vector.broadcast %4 : vector<1x64xf32> to vector<16x64xf32>
    %6 = arith.addf %3, %5 : vector<16x64xf32>
    %c0_6 = arith.constant 0 : index
    %c0_7 = arith.constant 0 : index
    %c0_8 = arith.constant 0 : index
    %7 = vector.load %arg4[%c0_6, %c0_7, %c0_8] : memref<1x16x64xf32, #tpu.memory_space<vmem>>, vector<1x16x64xf32>
    %8 = vector.shape_cast %7 : vector<1x16x64xf32> to vector<16x64xf32>
    %9 = vector.shape_cast %6 : vector<16x64xf32> to vector<1x16x64xf32>
    tpu.vector_store %arg4[%c0_6, %c0_7, %c0_8], %9 {strides = array<i32>} : memref<1x16x64xf32, #tpu.memory_space<vmem>>, vector<1x16x64xf32>,
    %cst_9 = arith.constant dense<0.000000e+00> : vector<64xf32>
    %10 = vector.multi_reduction <add>, %6, %cst_9 [0] : vector<16x64xf32> to vector<64xf32>
    %11 = vector.shape_cast %10 : vector<64xf32> to vector<1x64xf32>
    %c0_10 = arith.constant 0 : index
    %c0_11 = arith.constant 0 : index
    %c0_12 = arith.constant 0 : index
    %12 = vector.load %arg5[%c0_10, %c0_11, %c0_12] : memref<1x1x64xf32, #tpu.memory_space<vmem>>, vector<1x1x64xf32>
    %13 = vector.shape_cast %12 : vector<1x1x64xf32> to vector<1x64xf32>
    %14 = vector.shape_cast %11 : vector<1x64xf32> to vector<1x1x64xf32>
    tpu.vector_store %arg5[%c0_10, %c0_11, %c0_12], %14 {strides = array<i32>} : memref<1x1x64xf32, #tpu.memory_space<vmem>>, vector<1x1x64xf32>,
    %15 = arith.mulf %6, %6 : vector<16x64xf32>
    %cst_13 = arith.constant dense<0.000000e+00> : vector<64xf32>
    %16 = vector.multi_reduction <add>, %15, %cst_13 [0] : vector<16x64xf32> to vector<64xf32>
    %17 = vector.shape_cast %16 : vector<64xf32> to vector<1x64xf32>
    %c0_14 = arith.constant 0 : index
    %c0_15 = arith.constant 0 : index
    %c0_16 = arith.constant 0 : index
    %18 = vector.load %arg6[%c0_14, %c0_15, %c0_16] : memref<1x1x64xf32, #tpu.memory_space<vmem>>, vector<1x1x64xf32>
    %19 = vector.shape_cast %18 : vector<1x1x64xf32> to vector<1x64xf32>
    %20 = vector.shape_cast %17 : vector<1x64xf32> to vector<1x1x64xf32>
    tpu.vector_store %arg6[%c0_14, %c0_15, %c0_16], %20 {strides = array<i32>} : memref<1x1x64xf32, #tpu.memory_space<vmem>>, vector<1x1x64xf32>,
    return
  }
  func.func @transform_0(%arg0: i32) -> (i32, i32, i32) {
    %c0_i32 = arith.constant 0 : i32
    %c0_i32_0 = arith.constant 0 : i32
    %c0_i32_1 = arith.constant 0 : i32
    return %arg0, %c0_i32, %c0_i32_0 : i32, i32, i32
  }
  func.func @transform_1(%arg0: i32) -> (i32, i32) {
    %c0_i32 = arith.constant 0 : i32
    %c0_i32_0 = arith.constant 0 : i32
    %c0_i32_1 = arith.constant 0 : i32
    return %c0_i32, %c0_i32_0 : i32, i32
  }
  func.func @transform_2(%arg0: i32) -> (i32, i32) {
    %c0_i32 = arith.constant 0 : i32
    %c0_i32_0 = arith.constant 0 : i32
    %c0_i32_1 = arith.constant 0 : i32
    return %c0_i32, %c0_i32_0 : i32, i32
  }
  func.func @transform_3(%arg0: i32) -> (i32, i32, i32) {
    %c0_i32 = arith.constant 0 : i32
    %c0_i32_0 = arith.constant 0 : i32
    %c0_i32_1 = arith.constant 0 : i32
    return %arg0, %c0_i32, %c0_i32_0 : i32, i32, i32
  }
  func.func @transform_4(%arg0: i32) -> (i32, i32, i32) {
    %c0_i32 = arith.constant 0 : i32
    %c0_i32_0 = arith.constant 0 : i32
    %c0_i32_1 = arith.constant 0 : i32
    return %arg0, %c0_i32, %c0_i32_0 : i32, i32, i32
  }
  func.func @transform_5(%arg0: i32) -> (i32, i32, i32) {
    %c0_i32 = arith.constant 0 : i32
    %c0_i32_0 = arith.constant 0 : i32
    %c0_i32_1 = arith.constant 0 : i32
    return %arg0, %c0_i32, %c0_i32_0 : i32, i32, i32
  }
}

module attributes {stable_mosaic.version = 11 : i64} {
  func.func @_matmul_bias_stats_kernel(%arg0: i32, %arg1: memref<1x16x64xf32, #tpu.memory_space<vmem>>, %arg2: memref<64x64xf32, #tpu.memory_space<vmem>>, %arg3: memref<1x64xf32, #tpu.memory_space<vmem>>, %arg4: memref<1x16x64xf32, #tpu.memory_space<vmem>>, %arg5: memref<1x1x64xf32, #tpu.memory_space<vmem>>, %arg6: memref<1x1x64xf32, #tpu.memory_space<vmem>>) attributes {dimension_semantics = [#tpu.dimension_semantics<parallel>], iteration_bounds = array<i64: 2>, scalar_prefetch = 0 : i64, scratch_operands = 0 : i64, tpu.core_type = #tpu.core_type<tc>, window_params = [{transform_indices = @transform_0, window_bounds = array<i64: 1, 16, 64>}, {pipeline_mode = #tpu.pipeline_mode<synchronous>, transform_indices = @transform_1, window_bounds = array<i64: 64, 64>}, {pipeline_mode = #tpu.pipeline_mode<synchronous>, transform_indices = @transform_2, window_bounds = array<i64: 1, 64>}, {transform_indices = @transform_3, window_bounds = array<i64: 1, 16, 64>}, {transform_indices = @transform_4, window_bounds = array<i64: 1, 1, 64>}, {transform_indices = @transform_5, window_bounds = array<i64: 1, 1, 64>}]} {
    %c0 = arith.constant 0 : index
    %c0_0 = arith.constant 0 : index
    %c0_1 = arith.constant 0 : index
    %0 = vector.load %arg1[%c0, %c0_0, %c0_1] : memref<1x16x64xf32, #tpu.memory_space<vmem>>, vector<1x16x64xf32>
    %1 = vector.shape_cast %0 : vector<1x16x64xf32> to vector<16x64xf32>
    %c0_2 = arith.constant 0 : index
    %c0_3 = arith.constant 0 : index
    %2 = vector.load %arg2[%c0_2, %c0_3] : memref<64x64xf32, #tpu.memory_space<vmem>>, vector<64x64xf32>
    %cst = arith.constant dense<0.000000e+00> : vector<16x64xf32>
    %3 = tpu.matmul %1, %2, %cst {dimension_numbers = #tpu.dot_dimension_numbers<[1], [0], [0], [1], [0, 0, 1, 1], [], []>} : vector<16x64xf32>, vector<64x64xf32>, vector<16x64xf32> -> vector<16x64xf32>
    %c0_4 = arith.constant 0 : index
    %c0_5 = arith.constant 0 : index
    %4 = vector.load %arg3[%c0_4, %c0_5] : memref<1x64xf32, #tpu.memory_space<vmem>>, vector<1x64xf32>
    %5 = vector.broadcast %4 : vector<1x64xf32> to vector<16x64xf32>
    %6 = arith.addf %3, %5 : vector<16x64xf32>
    %c0_6 = arith.constant 0 : index
    %c0_7 = arith.constant 0 : index
    %c0_8 = arith.constant 0 : index
    %7 = vector.load %arg4[%c0_6, %c0_7, %c0_8] : memref<1x16x64xf32, #tpu.memory_space<vmem>>, vector<1x16x64xf32>
    %8 = vector.shape_cast %7 : vector<1x16x64xf32> to vector<16x64xf32>
    %9 = vector.shape_cast %6 : vector<16x64xf32> to vector<1x16x64xf32>
    tpu.vector_store %arg4[%c0_6, %c0_7, %c0_8], %9 {strides = array<i32>} : memref<1x16x64xf32, #tpu.memory_space<vmem>>, vector<1x16x64xf32>,
    %cst_9 = arith.constant dense<0.000000e+00> : vector<64xf32>
    %10 = vector.multi_reduction <add>, %6, %cst_9 [0] : vector<16x64xf32> to vector<64xf32>
    %11 = vector.shape_cast %10 : vector<64xf32> to vector<1x64xf32>
    %c0_10 = arith.constant 0 : index
    %c0_11 = arith.constant 0 : index
    %c0_12 = arith.constant 0 : index
    %12 = vector.load %arg5[%c0_10, %c0_11, %c0_12] : memref<1x1x64xf32, #tpu.memory_space<vmem>>, vector<1x1x64xf32>
    %13 = vector.shape_cast %12 : vector<1x1x64xf32> to vector<1x64xf32>
    %14 = vector.shape_cast %11 : vector<1x64xf32> to vector<1x1x64xf32>
    tpu.vector_store %arg5[%c0_10, %c0_11, %c0_12], %14 {strides = array<i32>} : memref<1x1x64xf32, #tpu.memory_space<vmem>>, vector<1x1x64xf32>,
    %15 = arith.mulf %6, %6 : vector<16x64xf32>
    %cst_13 = arith.constant dense<0.000000e+00> : vector<64xf32>
    %16 = vector.multi_reduction <add>, %15, %cst_13 [0] : vector<16x64xf32> to vector<64xf32>
    %17 = vector.shape_cast %16 : vector<64xf32> to vector<1x64xf32>
    %c0_14 = arith.constant 0 : index
    %c0_15 = arith.constant 0 : index
    %c0_16 = arith.constant 0 : index
    %18 = vector.load %arg6[%c0_14, %c0_15, %c0_16] : memref<1x1x64xf32, #tpu.memory_space<vmem>>, vector<1x1x64xf32>
    %19 = vector.shape_cast %18 : vector<1x1x64xf32> to vector<1x64xf32>
    %20 = vector.shape_cast %17 : vector<1x64xf32> to vector<1x1x64xf32>
    tpu.vector_store %arg6[%c0_14, %c0_15, %c0_16], %20 {strides = array<i32>} : memref<1x1x64xf32, #tpu.memory_space<vmem>>, vector<1x1x64xf32>,
    return
  }
  func.func @transform_0(%arg0: i32) -> (i32, i32, i32) {
    %c0_i32 = arith.constant 0 : i32
    %c0_i32_0 = arith.constant 0 : i32
    %c0_i32_1 = arith.constant 0 : i32
    return %arg0, %c0_i32, %c0_i32_0 : i32, i32, i32
  }
  func.func @transform_1(%arg0: i32) -> (i32, i32) {
    %c0_i32 = arith.constant 0 : i32
    %c0_i32_0 = arith.constant 0 : i32
    %c0_i32_1 = arith.constant 0 : i32
    return %c0_i32, %c0_i32_0 : i32, i32
  }
  func.func @transform_2(%arg0: i32) -> (i32, i32) {
    %c0_i32 = arith.constant 0 : i32
    %c0_i32_0 = arith.constant 0 : i32
    %c0_i32_1 = arith.constant 0 : i32
    return %c0_i32, %c0_i32_0 : i32, i32
  }
  func.func @transform_3(%arg0: i32) -> (i32, i32, i32) {
    %c0_i32 = arith.constant 0 : i32
    %c0_i32_0 = arith.constant 0 : i32
    %c0_i32_1 = arith.constant 0 : i32
    return %arg0, %c0_i32, %c0_i32_0 : i32, i32, i32
  }
  func.func @transform_4(%arg0: i32) -> (i32, i32, i32) {
    %c0_i32 = arith.constant 0 : i32
    %c0_i32_0 = arith.constant 0 : i32
    %c0_i32_1 = arith.constant 0 : i32
    return %arg0, %c0_i32, %c0_i32_0 : i32, i32, i32
  }
  func.func @transform_5(%arg0: i32) -> (i32, i32, i32) {
    %c0_i32 = arith.constant 0 : i32
    %c0_i32_0 = arith.constant 0 : i32
    %c0_i32_1 = arith.constant 0 : i32
    return %arg0, %c0_i32, %c0_i32_0 : i32, i32, i32
  }
}

module attributes {stable_mosaic.version = 11 : i64} {
  func.func @_dual_bn_relu_add_kernel(%arg0: i32, %arg1: memref<1x16x64xf32, #tpu.memory_space<vmem>>, %arg2: memref<1x64xf32, #tpu.memory_space<vmem>>, %arg3: memref<1x64xf32, #tpu.memory_space<vmem>>, %arg4: memref<1x16x64xf32, #tpu.memory_space<vmem>>, %arg5: memref<1x64xf32, #tpu.memory_space<vmem>>, %arg6: memref<1x64xf32, #tpu.memory_space<vmem>>, %arg7: memref<1x16x64xf32, #tpu.memory_space<vmem>>) attributes {dimension_semantics = [#tpu.dimension_semantics<parallel>], iteration_bounds = array<i64: 2>, scalar_prefetch = 0 : i64, scratch_operands = 0 : i64, tpu.core_type = #tpu.core_type<tc>, window_params = [{transform_indices = @transform_0, window_bounds = array<i64: 1, 16, 64>}, {pipeline_mode = #tpu.pipeline_mode<synchronous>, transform_indices = @transform_1, window_bounds = array<i64: 1, 64>}, {pipeline_mode = #tpu.pipeline_mode<synchronous>, transform_indices = @transform_2, window_bounds = array<i64: 1, 64>}, {transform_indices = @transform_3, window_bounds = array<i64: 1, 16, 64>}, {pipeline_mode = #tpu.pipeline_mode<synchronous>, transform_indices = @transform_4, window_bounds = array<i64: 1, 64>}, {pipeline_mode = #tpu.pipeline_mode<synchronous>, transform_indices = @transform_5, window_bounds = array<i64: 1, 64>}, {transform_indices = @transform_6, window_bounds = array<i64: 1, 16, 64>}]} {
    %c0 = arith.constant 0 : index
    %c0_0 = arith.constant 0 : index
    %c0_1 = arith.constant 0 : index
    %0 = vector.load %arg1[%c0, %c0_0, %c0_1] : memref<1x16x64xf32, #tpu.memory_space<vmem>>, vector<1x16x64xf32>
    %1 = vector.shape_cast %0 : vector<1x16x64xf32> to vector<16x64xf32>
    %c0_2 = arith.constant 0 : index
    %c0_3 = arith.constant 0 : index
    %2 = vector.load %arg2[%c0_2, %c0_3] : memref<1x64xf32, #tpu.memory_space<vmem>>, vector<1x64xf32>
    %3 = vector.broadcast %2 : vector<1x64xf32> to vector<16x64xf32>
    %4 = arith.mulf %1, %3 : vector<16x64xf32>
    %c0_4 = arith.constant 0 : index
    %c0_5 = arith.constant 0 : index
    %5 = vector.load %arg3[%c0_4, %c0_5] : memref<1x64xf32, #tpu.memory_space<vmem>>, vector<1x64xf32>
    %6 = vector.broadcast %5 : vector<1x64xf32> to vector<16x64xf32>
    %7 = arith.addf %4, %6 : vector<16x64xf32>
    %cst = arith.constant 0.000000e+00 : f32
    %8 = vector.broadcast %cst : f32 to vector<16x64xf32>
    %9 = arith.maximumf %7, %8 : vector<16x64xf32>
    %c0_6 = arith.constant 0 : index
    %c0_7 = arith.constant 0 : index
    %c0_8 = arith.constant 0 : index
    %10 = vector.load %arg4[%c0_6, %c0_7, %c0_8] : memref<1x16x64xf32, #tpu.memory_space<vmem>>, vector<1x16x64xf32>
    %11 = vector.shape_cast %10 : vector<1x16x64xf32> to vector<16x64xf32>
    %c0_9 = arith.constant 0 : index
    %c0_10 = arith.constant 0 : index
    %12 = vector.load %arg5[%c0_9, %c0_10] : memref<1x64xf32, #tpu.memory_space<vmem>>, vector<1x64xf32>
    %13 = vector.broadcast %12 : vector<1x64xf32> to vector<16x64xf32>
    %14 = arith.mulf %11, %13 : vector<16x64xf32>
    %c0_11 = arith.constant 0 : index
    %c0_12 = arith.constant 0 : index
    %15 = vector.load %arg6[%c0_11, %c0_12] : memref<1x64xf32, #tpu.memory_space<vmem>>, vector<1x64xf32>
    %16 = vector.broadcast %15 : vector<1x64xf32> to vector<16x64xf32>
    %17 = arith.addf %14, %16 : vector<16x64xf32>
    %cst_13 = arith.constant 0.000000e+00 : f32
    %18 = vector.broadcast %cst_13 : f32 to vector<16x64xf32>
    %19 = arith.maximumf %17, %18 : vector<16x64xf32>
    %20 = arith.addf %9, %19 : vector<16x64xf32>
    %c0_14 = arith.constant 0 : index
    %c0_15 = arith.constant 0 : index
    %c0_16 = arith.constant 0 : index
    %21 = vector.load %arg7[%c0_14, %c0_15, %c0_16] : memref<1x16x64xf32, #tpu.memory_space<vmem>>, vector<1x16x64xf32>
    %22 = vector.shape_cast %21 : vector<1x16x64xf32> to vector<16x64xf32>
    %23 = vector.shape_cast %20 : vector<16x64xf32> to vector<1x16x64xf32>
    tpu.vector_store %arg7[%c0_14, %c0_15, %c0_16], %23 {strides = array<i32>} : memref<1x16x64xf32, #tpu.memory_space<vmem>>, vector<1x16x64xf32>,
    return
  }
  func.func @transform_0(%arg0: i32) -> (i32, i32, i32) {
    %c0_i32 = arith.constant 0 : i32
    %c0_i32_0 = arith.constant 0 : i32
    %c0_i32_1 = arith.constant 0 : i32
    return %arg0, %c0_i32, %c0_i32_0 : i32, i32, i32
  }
  func.func @transform_1(%arg0: i32) -> (i32, i32) {
    %c0_i32 = arith.constant 0 : i32
    %c0_i32_0 = arith.constant 0 : i32
    %c0_i32_1 = arith.constant 0 : i32
    return %c0_i32, %c0_i32_0 : i32, i32
  }
  func.func @transform_2(%arg0: i32) -> (i32, i32) {
    %c0_i32 = arith.constant 0 : i32
    %c0_i32_0 = arith.constant 0 : i32
    %c0_i32_1 = arith.constant 0 : i32
    return %c0_i32, %c0_i32_0 : i32, i32
  }
  func.func @transform_3(%arg0: i32) -> (i32, i32, i32) {
    %c0_i32 = arith.constant 0 : i32
    %c0_i32_0 = arith.constant 0 : i32
    %c0_i32_1 = arith.constant 0 : i32
    return %arg0, %c0_i32, %c0_i32_0 : i32, i32, i32
  }
  func.func @transform_4(%arg0: i32) -> (i32, i32) {
    %c0_i32 = arith.constant 0 : i32
    %c0_i32_0 = arith.constant 0 : i32
    %c0_i32_1 = arith.constant 0 : i32
    return %c0_i32, %c0_i32_0 : i32, i32
  }
  func.func @transform_5(%arg0: i32) -> (i32, i32) {
    %c0_i32 = arith.constant 0 : i32
    %c0_i32_0 = arith.constant 0 : i32
    %c0_i32_1 = arith.constant 0 : i32
    return %c0_i32, %c0_i32_0 : i32, i32
  }
  func.func @transform_6(%arg0: i32) -> (i32, i32, i32) {
    %c0_i32 = arith.constant 0 : i32
    %c0_i32_0 = arith.constant 0 : i32
    %c0_i32_1 = arith.constant 0 : i32
    return %arg0, %c0_i32, %c0_i32_0 : i32, i32, i32
  }
}

module attributes {stable_mosaic.version = 11 : i64} {
  func.func @_bn_relu_kernel(%arg0: i32, %arg1: memref<1x16x64xf32, #tpu.memory_space<vmem>>, %arg2: memref<1x64xf32, #tpu.memory_space<vmem>>, %arg3: memref<1x64xf32, #tpu.memory_space<vmem>>, %arg4: memref<1x16x64xf32, #tpu.memory_space<vmem>>) attributes {dimension_semantics = [#tpu.dimension_semantics<parallel>], iteration_bounds = array<i64: 2>, scalar_prefetch = 0 : i64, scratch_operands = 0 : i64, tpu.core_type = #tpu.core_type<tc>, window_params = [{transform_indices = @transform_0, window_bounds = array<i64: 1, 16, 64>}, {pipeline_mode = #tpu.pipeline_mode<synchronous>, transform_indices = @transform_1, window_bounds = array<i64: 1, 64>}, {pipeline_mode = #tpu.pipeline_mode<synchronous>, transform_indices = @transform_2, window_bounds = array<i64: 1, 64>}, {transform_indices = @transform_3, window_bounds = array<i64: 1, 16, 64>}]} {
    %c0 = arith.constant 0 : index
    %c0_0 = arith.constant 0 : index
    %c0_1 = arith.constant 0 : index
    %0 = vector.load %arg1[%c0, %c0_0, %c0_1] : memref<1x16x64xf32, #tpu.memory_space<vmem>>, vector<1x16x64xf32>
    %1 = vector.shape_cast %0 : vector<1x16x64xf32> to vector<16x64xf32>
    %c0_2 = arith.constant 0 : index
    %c0_3 = arith.constant 0 : index
    %2 = vector.load %arg2[%c0_2, %c0_3] : memref<1x64xf32, #tpu.memory_space<vmem>>, vector<1x64xf32>
    %3 = vector.broadcast %2 : vector<1x64xf32> to vector<16x64xf32>
    %4 = arith.mulf %1, %3 : vector<16x64xf32>
    %c0_4 = arith.constant 0 : index
    %c0_5 = arith.constant 0 : index
    %5 = vector.load %arg3[%c0_4, %c0_5] : memref<1x64xf32, #tpu.memory_space<vmem>>, vector<1x64xf32>
    %6 = vector.broadcast %5 : vector<1x64xf32> to vector<16x64xf32>
    %7 = arith.addf %4, %6 : vector<16x64xf32>
    %cst = arith.constant 0.000000e+00 : f32
    %8 = vector.broadcast %cst : f32 to vector<16x64xf32>
    %9 = arith.maximumf %7, %8 : vector<16x64xf32>
    %c0_6 = arith.constant 0 : index
    %c0_7 = arith.constant 0 : index
    %c0_8 = arith.constant 0 : index
    %10 = vector.load %arg4[%c0_6, %c0_7, %c0_8] : memref<1x16x64xf32, #tpu.memory_space<vmem>>, vector<1x16x64xf32>
    %11 = vector.shape_cast %10 : vector<1x16x64xf32> to vector<16x64xf32>
    %12 = vector.shape_cast %9 : vector<16x64xf32> to vector<1x16x64xf32>
    tpu.vector_store %arg4[%c0_6, %c0_7, %c0_8], %12 {strides = array<i32>} : memref<1x16x64xf32, #tpu.memory_space<vmem>>, vector<1x16x64xf32>,
    return
  }
  func.func @transform_0(%arg0: i32) -> (i32, i32, i32) {
    %c0_i32 = arith.constant 0 : i32
    %c0_i32_0 = arith.constant 0 : i32
    %c0_i32_1 = arith.constant 0 : i32
    return %arg0, %c0_i32, %c0_i32_0 : i32, i32, i32
  }
  func.func @transform_1(%arg0: i32) -> (i32, i32) {
    %c0_i32 = arith.constant 0 : i32
    %c0_i32_0 = arith.constant 0 : i32
    %c0_i32_1 = arith.constant 0 : i32
    return %c0_i32, %c0_i32_0 : i32, i32
  }
  func.func @transform_2(%arg0: i32) -> (i32, i32) {
    %c0_i32 = arith.constant 0 : i32
    %c0_i32_0 = arith.constant 0 : i32
    %c0_i32_1 = arith.constant 0 : i32
    return %c0_i32, %c0_i32_0 : i32, i32
  }
  func.func @transform_3(%arg0: i32) -> (i32, i32, i32) {
    %c0_i32 = arith.constant 0 : i32
    %c0_i32_0 = arith.constant 0 : i32
    %c0_i32_1 = arith.constant 0 : i32
    return %arg0, %c0_i32, %c0_i32_0 : i32, i32, i32
  }
}

</mosaic_0001>

<bundles_post_ra>
// kernel: fpn_forward_pallas.10
= control target key start
LH: loop header
LB: loop body
LE: loop exit
PB: predicated region body
PF: predicated region fallthrough
CT: control target
= control target key end

     0   :  { %s519_s21 = smov 0   ;;  %s634_s0 = inlined_call_operand.vmem [shape: f32[2,64,32], index: 0, kind: input, shape index: {}]   ;;  %s635_s1 = inlined_call_operand.vmem [shape: f32[1,32], index: 1, kind: input, shape index: {}]   ;;  %s636_s2 = inlined_call_operand.vmem [shape: f32[1,32], index: 2, kind: input, shape index: {}]   ;;  %s637_s3 = inlined_call_operand.vmem [shape: f32[2,64,32], index: 3, kind: input, shape index: {}]   ;;  %s638_s4 = inlined_call_operand.vmem [shape: f32[1,32], index: 4, kind: input, shape index: {}]   ;;  %s639_s5 = inlined_call_operand.vmem [shape: f32[1,32], index: 5, kind: input, shape index: {}]   ;;  %s640_s6 = inlined_call_operand.vmem [shape: f32[2,64,32], index: 6, kind: output, shape index: {}]  }
   0x1 LB: > { %s448_s22 = sadd.s32 4294967295, %s482_s21   ;;  %p452_p0 = scmp.ge.s32.totalorder %s482_s21, 1  ;;  %s482_s21 = sphi %s519_s21, %s16_s21  }
   0x2   : > { %p222_p1 = scmp.lt.s32.totalorder %s482_s21, 3 }
   0x4   : > { %p223_p2 = pnand %p452_p0, %p222_p1 }
   0x5   : > { %p257_p3 = scmp.lt.s32.totalorder (!%p223_p2), %s448_s22, 1  ;;  %v532_v0 = vld [vmem:[%s635_s1] ss:$0 sm:$0xff] (!%p223_p2)  ;;  %vm372_vm0 = vcmask (!%p223_p2), 261120  }
   0x6   : > { %226 = sbr.rel (%p223_p2) target bundleno = 37 (0x25), region = 44  ;;  %v537_v1 = vld [vmem:[%s638_s4] ss:$0 sm:$0xff] (!%p223_p2) }
   0x7   : > { %v554_v2 = vld [vmem:[%s636_s2] ss:$0 sm:$0xff] (!%p223_p2) }
   0x8   : > { %v559_v3 = vld [vmem:[%s639_s5] ss:$0 sm:$0xff] (!%p223_p2) }
   0xd   : > { %s642_s22 = smov (!%p257_p3, %s448_s22), 1 }
   0xe   : > { %s527_s23 = sshll.u32 %s642_s22, 6 }
   0xf   : > { %s543_s30 = scalar_lea.vmem %s634_s0, %s527_s23  ;;  %s549_s9 = scalar_lea.vmem %s637_s3, %s527_s23 }
  0x10   : > { %v272_v4 = vld [vmem:[%s543_s30] sm:$0xff]  ;;  %v273_v6 = vld [vmem:[%s543_s30 + $0x8] sm:$0xff]  ;;  %v274_v11 = vld [vmem:[%s543_s30 + $0x10] sm:$0xff]  ;;  %s591_s16 = scalar_lea.vmem %s640_s6, %s527_s23 }
  0x11   : > { %v318_v5 = vld [vmem:[%s549_s9] sm:$0xff]  ;;  %v287_v7 = vmul.f32 %v532_v0, %v272_v4  ;;  %v288_v9 = vmul.f32 %v532_v0, %v273_v6  ;;  %v319_v10 = vld [vmem:[%s549_s9 + $0x8] sm:$0xff]  ;;  %v320_v12 = vld [vmem:[%s549_s9 + $0x10] sm:$0xff]  ;;  %v289_v14 = vmul.f32 %v532_v0, %v274_v11 }
  0x12   : > { %v333_v8 = vmul.f32 %v537_v1, %v318_v5  ;;  %v334_v13 = vmul.f32 %v537_v1, %v319_v10  ;;  %v335_v15 = vmul.f32 %v537_v1, %v320_v12  ;;  %v275_v16 = vld [vmem:[%s543_s30 + $0x18] sm:$0xff]  ;;  %v276_v26 = vld [vmem:[%s543_s30 + $0x20] sm:$0xff]  ;;  %v277_v32 = vld [vmem:[%s543_s30 + $0x28] sm:$0xff] }
  0x13   : > { %v321_v17 = vld [vmem:[%s549_s9 + $0x18] sm:$0xff]  ;;  %v302_v18 = vadd.f32 %v554_v2, %v287_v7  ;;  %v303_v20 = vadd.f32 %v554_v2, %v288_v9  ;;  %v290_v21 = vmul.f32 %v532_v0, %v275_v16  ;;  %v304_v23 = vadd.f32 %v554_v2, %v289_v14  ;;  %v322_v27 = vld [vmem:[%s549_s9 + $0x20] sm:$0xff]  ;;  %v323_v37 = vld [vmem:[%s549_s9 + $0x28] sm:$0xff] }
  0x14   : > { %v348_v19 = vadd.f32 %v559_v3, %v333_v8  ;;  %v349_v22 = vadd.f32 %v559_v3, %v334_v13  ;;  %v350_v24 = vadd.f32 %v559_v3, %v335_v15  ;;  %v336_v25 = vmul.f32 %v537_v1, %v321_v17  ;;  %v278_v38 = vld [vmem:[%s543_s30 + $0x30] sm:$0xff]  ;;  %v279_v44 = vld [vmem:[%s543_s30 + $0x38] sm:$0xff] }
  0x15   : > { %v310_v28 = vmax.f32 %v302_v18, 0.0  ;;  %v311_v30 = vmax.f32 %v303_v20, 0.0  ;;  %v305_v31 = vadd.f32 %v554_v2, %v290_v21  ;;  %v312_v34 = vmax.f32 %v304_v23, 0.0  ;;  %v324_v43 = vld [vmem:[%s549_s9 + $0x30] sm:$0xff]  ;;  %v325_v53 = vld [vmem:[%s549_s9 + $0x38] sm:$0xff] }
  0x16   : > { %v356_v29 = vmax.f32 %v348_v19, 0.0  ;;  %v357_v33 = vmax.f32 %v349_v22, 0.0  ;;  %v358_v35 = vmax.f32 %v350_v24, 0.0  ;;  %v351_v36 = vadd.f32 %v559_v3, %v336_v25 }
  0x17   : > { %v313_v40 = vmax.f32 %v305_v31, 0.0  ;;  %v291_v41 = vmul.f32 %v532_v0, %v276_v26  ;;  %v337_v42 = vmul.f32 %v537_v1, %v322_v27  ;;  %v292_v48 = vmul.f32 %v532_v0, %v277_v32 }
  0x18   : > { %v364_v39 = vadd.f32 %v356_v29, %v310_v28  ;;  %v365_v45 = vadd.f32 %v357_v33, %v311_v30  ;;  %v366_v46 = vadd.f32 %v358_v35, %v312_v34  ;;  %v359_v47 = vmax.f32 %v351_v36, 0.0 }
  0x19   : > { %v306_v49 = vadd.f32 %v554_v2, %v291_v41  ;;  %v352_v50 = vadd.f32 %v559_v3, %v337_v42  ;;  %v338_v51 = vmul.f32 %v537_v1, %v323_v37  ;;  %v293_v52 = vmul.f32 %v532_v0, %v278_v38 }
  0x1a   : > { %373 = vst.msk [vmem:[%s591_s16] sm:$0xff] %vm372_vm0, %v364_v39  ;;  %374 = vst.msk [vmem:[%s591_s16 + $0x8] sm:$0xff] %vm372_vm0, %v365_v45  ;;  %v367_v54 = vadd.f32 %v359_v47, %v313_v40  ;;  %v307_v55 = vadd.f32 %v554_v2, %v292_v48  ;;  %v339_v56 = vmul.f32 %v537_v1, %v324_v43 }
  0x1b   : > { %375 = vst.msk [vmem:[%s591_s16 + $0x10] sm:$0xff] %vm372_vm0, %v366_v46  ;;  %v294_v57 = vmul.f32 %v532_v0, %v279_v44  ;;  %v314_v58 = vmax.f32 %v306_v49, 0.0  ;;  %v360_v59 = vmax.f32 %v352_v50, 0.0  ;;  %v353_v60 = vadd.f32 %v559_v3, %v338_v51 }
  0x1c   : > { %v308_v61 = vadd.f32 %v554_v2, %v293_v52  ;;  %376 = vst.msk [vmem:[%s591_s16 + $0x18] sm:$0xff] %vm372_vm0, %v367_v54  ;;  %v315_v62 = vmax.f32 %v307_v55, 0.0  ;;  %v354_v63 = vadd.f32 %v559_v3, %v339_v56  ;;  %v340_v5 = vmul.f32 %v537_v1, %v325_v53 }
  0x1d   : > { %v309_v4 = vadd.f32 %v554_v2, %v294_v57  ;;  %v368_v0 = vadd.f32 %v360_v59, %v314_v58  ;;  %v361_v6 = vmax.f32 %v353_v60, 0.0 }
  0x1e   : > { %v316_v7 = vmax.f32 %v308_v61, 0.0  ;;  %v362_v8 = vmax.f32 %v354_v63, 0.0  ;;  %v355_v10 = vadd.f32 %v559_v3, %v340_v5 }
  0x1f   : > { %v317_v9 = vmax.f32 %v309_v4, 0.0  ;;  %377 = vst.msk [vmem:[%s591_s16 + $0x20] sm:$0xff] %vm372_vm0, %v368_v0  ;;  %v369_v11 = vadd.f32 %v361_v6, %v315_v62 }
  0x20   : > { %v370_v12 = vadd.f32 %v362_v8, %v316_v7  ;;  %v363_v13 = vmax.f32 %v355_v10, 0.0 }
  0x21   : > { %378 = vst.msk [vmem:[%s591_s16 + $0x28] sm:$0xff] %vm372_vm0, %v369_v11 }
  0x22   : > { %379 = vst.msk [vmem:[%s591_s16 + $0x30] sm:$0xff] %vm372_vm0, %v370_v12  ;;  %v371_v14 = vadd.f32 %v363_v13, %v317_v9 }
  0x24   : > { %380 = vst.msk [vmem:[%s591_s16 + $0x38] sm:$0xff] %vm372_vm0, %v371_v14 }
  0x25 PF: > { %s16_s21 = sadd.s32 1, %s482_s21  }
  0x26   : > { %p13_p4 = scmp.ge.s32.totalorder %s16_s21, 4  }
  0x28   :  { %15 = sbr.rel (!%p13_p4) target bundleno = 1 (0x1), region = 77 }

// kernel: fpn_forward_pallas.9
= control target key start
LH: loop header
LB: loop body
LE: loop exit
PB: predicated region body
PF: predicated region fallthrough
CT: control target
= control target key end

     0   :  { %s669_s18 = smov 0   ;;  %s754_s0 = inlined_call_operand.vmem [shape: f32[2,64,32], index: 0, kind: input, shape index: {}]   ;;  %s755_s1 = inlined_call_operand.vmem [shape: f32[32,32], index: 1, kind: input, shape index: {}]   ;;  %s756_s2 = inlined_call_operand.vmem [shape: f32[1,32], index: 2, kind: input, shape index: {}]   ;;  %s757_s3 = inlined_call_operand.vmem [shape: f32[2,64,32], index: 3, kind: output, shape index: {0}]   ;;  %s758_s4 = inlined_call_operand.vmem [shape: f32[2,1,32], index: 4, kind: output, shape index: {1}]   ;;  %s759_s5 = inlined_call_operand.vmem [shape: f32[2,1,32], index: 5, kind: output, shape index: {2}]  }
   0x1 LB: > { %s557_s19 = sadd.s32 4294967295, %s637_s18   ;;  %p561_p0 = scmp.ge.s32.totalorder %s637_s18, 1  ;;  %s637_s18 = sphi %s669_s18, %s16_s18  }
   0x2   : > { %p192_p1 = scmp.lt.s32.totalorder %s637_s18, 3 }
   0x4   : > { %p193_p2 = pnand %p561_p0, %p192_p1 }
   0x5   : > { %v250_v0 = vld [vmem:[%s755_s1] sm:$0xff] (!%p193_p2)  ;;  %v251_v1 = vld [vmem:[%s755_s1 + $0x8] sm:$0xff] (!%p193_p2)  ;;  %v252_v2 = vld [vmem:[%s755_s1 + $0x10] sm:$0xff] (!%p193_p2)  ;;  %p226_p3 = scmp.lt.s32.totalorder (!%p193_p2), %s557_s19, 1  ;;  %vm261_vm0 = vcmask (!%p193_p2), 261120   ;;  %vm420_vm1 = vcmask (!%p193_p2), 253952  }
   0x6   : > { %196 = sbr.rel (%p193_p2) target bundleno = 265 (0x109), region = 32  ;;  %v611_v3 = vpack.c.bf16 (!%p193_p2), %v251_v1, %v250_v0  ;;  %v253_v4 = vld [vmem:[%s755_s1 + $0x18] sm:$0xff] (!%p193_p2)  ;;  %v566_v14 = vld [vmem:[%s756_s2] ss:$0 sm:$0xff] (!%p193_p2) }
   0x7   : > { %v615_v5 = vpack.c.bf16 (!%p193_p2), %v253_v4, %v252_v2 }
   0x8   : > { %612 = vmatprep.subr.bf16.mxu0 (!%p193_p2), %v611_v3  ;;  %619 = vmatprep.subr.bf16.mxu1 (!%p193_p2), %v611_v3 }
   0x9   : > { %614 = vmatpush3.bf16.msra.mxu0 (!%p193_p2), %v611_v3  ;;  %621 = vmatpush3.bf16.msra.mxu1 (!%p193_p2), %v611_v3 }
   0xa   : > { %616 = vmatprep.subr.bf16.mxu0 (!%p193_p2), %v615_v5  ;;  %620 = vmatprep.subr.bf16.mxu1 (!%p193_p2), %v615_v5 }
   0xd   : > { %s761_s19 = smov (!%p226_p3, %s557_s19), 1  ;;  %618 = vmatpush3.bf16.msra.mxu0 %v615_v5  ;;  %622 = vmatpush3.bf16.msra.mxu1 %v615_v5 }
   0xe   : > { %s577_s28 = sshll.u32 %s761_s19, 6  ;;  %s238_s14 = scalar_lea.vmem %s758_s4, %s761_s19 }
   0xf   : > { %s230_s6 = scalar_lea.vmem %s754_s0, %s577_s28  ;;  %s709_s11 = scalar_lea.vmem %s757_s3, %s577_s28 }
  0x10   : > { %v242_v6 = vld [vmem:[%s230_s6] sm:$0xff]  ;;  %v243_v8 = vld [vmem:[%s230_s6 + $0x8] sm:$0xff]  ;;  %v244_v10 = vld [vmem:[%s230_s6 + $0x10] sm:$0xff]  ;;  %s241_s17 = scalar_lea.vmem %s759_s5, %s761_s19 }
  0x11   : > { %599 = vmatprep.mubr.msk.f32.mxu0 %vm261_vm0, %v242_v6  ;;  %v246_v7 = vld [vmem:[%s230_s6 + $0x20] sm:$0xff]  ;;  %v247_v9 = vld [vmem:[%s230_s6 + $0x28] sm:$0xff]  ;;  %v248_v11 = vld [vmem:[%s230_s6 + $0x30] sm:$0xff] }
  0x12   : > { %605 = vmatprep.mubr.msk.f32.mxu1 %vm261_vm0, %v246_v7  ;;  %600 = vmatmul.mubr.msk.f32.vlgmr.msra.gmra.mrb[0].mxu0 %vm261_vm0, %v243_v8  ;;  %v245_v12 = vld [vmem:[%s230_s6 + $0x18] sm:$0xff] }
  0x13   : > { %606 = vmatmul.mubr.msk.f32.vlgmr.msra.gmra.mrb[0].mxu1 %vm261_vm0, %v247_v9  ;;  %602 = vmatprep.mubr.msk.f32.mxu0 %vm261_vm0, %v244_v10  ;;  %v249_v13 = vld [vmem:[%s230_s6 + $0x38] sm:$0xff] }
  0x14   : > { %608 = vmatprep.mubr.msk.f32.mxu1 %vm261_vm0, %v248_v11 }
  0x16   : > { %603 = vmatmul.mubr.msk.f32.gmra.mrb[2].mxu0 %vm261_vm0, %v245_v12 }
  0x17   : > { %609 = vmatmul.mubr.msk.f32.gmra.mrb[2].mxu1 %vm261_vm0, %v249_v13 }
  0xe5   : > { %v601_v15 = vpop.f32.mrb[0].mxu0 }
  0xe6   : > { %v607_v16 = vpop.f32.mrb[0].mxu1  ;;  %v358_v17 = vadd.f32 %v601_v15, %v566_v14  ;;  %v352_v18 = vpop.f32.mrb[1].mxu0 }
  0xe7   : > { %v378_v19 = vadd.f32 %v607_v16, %v566_v14  ;;  %v372_v20 = vpop.f32.mrb[1].mxu1  ;;  %v353_v21 = vadd.f32 %v566_v14, %v352_v18 }
  0xe8   : > { %v373_v22 = vadd.f32 %v566_v14, %v372_v20  ;;  %392 = vst.msk [vmem:[%s709_s11 + $0x8] sm:$0xff] %vm261_vm0, %v358_v17  ;;  %v400_v23 = vsel %vm261_vm0, %v358_v17, 0.0  ;;  %v423_v24 = vmul.f32 %v358_v17, %v358_v17 }
  0xe9   : > { %396 = vst.msk [vmem:[%s709_s11 + $0x28] sm:$0xff] %vm261_vm0, %v378_v19  ;;  %391 = vst.msk [vmem:[%s709_s11] sm:$0xff] %vm261_vm0, %v353_v21  ;;  %v399_v25 = vsel %vm261_vm0, %v353_v21, 0.0  ;;  %v422_v26 = vmul.f32 %v353_v21, %v353_v21  ;;  %v604_v27 = vpop.f32.mrb[2].mxu0  ;;  %v427_v50 = vmul.f32 %v378_v19, %v378_v19  ;;  %v408_v55 = vsel %vm261_vm0, %v378_v19, 0.0 }
  0xea   : > { %395 = vst.msk [vmem:[%s709_s11 + $0x20] sm:$0xff] %vm261_vm0, %v373_v22  ;;  %v610_v28 = vpop.f32.mrb[2].mxu1  ;;  %v431_v29 = vsel %vm261_vm0, %v423_v24, 0.0  ;;  %v401_v30 = vadd.f32 %v400_v23, %v399_v25  ;;  %v368_v31 = vadd.f32 %v604_v27, %v566_v14  ;;  %v362_v32 = vpop.f32.mrb[3].mxu0  ;;  %v426_v42 = vmul.f32 %v373_v22, %v373_v22 }
  0xeb   : > { %v382_v33 = vpop.f32.mrb[3].mxu1  ;;  %v430_v34 = vsel %vm261_vm0, %v422_v26, 0.0  ;;  %v363_v35 = vadd.f32 %v566_v14, %v362_v32  ;;  %v388_v36 = vadd.f32 %v610_v28, %v566_v14  ;;  %v406_v46 = vsel %vm261_vm0, %v373_v22, 0.0 }
  0xec   : > { %v432_v37 = vadd.f32 %v431_v29, %v430_v34  ;;  %394 = vst.msk [vmem:[%s709_s11 + $0x18] sm:$0xff] %vm261_vm0, %v368_v31  ;;  %v383_v38 = vadd.f32 %v566_v14, %v382_v33  ;;  %v425_v39 = vmul.f32 %v368_v31, %v368_v31  ;;  %v404_v44 = vsel %vm261_vm0, %v368_v31, 0.0 }
  0xed   : > { %393 = vst.msk [vmem:[%s709_s11 + $0x10] sm:$0xff] %vm261_vm0, %v363_v35  ;;  %v402_v40 = vsel %vm261_vm0, %v363_v35, 0.0  ;;  %v424_v41 = vmul.f32 %v363_v35, %v363_v35  ;;  %398 = vst.msk [vmem:[%s709_s11 + $0x38] sm:$0xff] %vm261_vm0, %v388_v36  ;;  %v437_v51 = vsel %vm261_vm0, %v426_v42, 0.0  ;;  %v439_v59 = vsel %vm261_vm0, %v427_v50, 0.0 }
  0xee   : > { %v403_v43 = vadd.f32 %v402_v40, %v401_v30  ;;  %397 = vst.msk [vmem:[%s709_s11 + $0x30] sm:$0xff] %vm261_vm0, %v383_v38  ;;  %v435_v49 = vsel %vm261_vm0, %v425_v39, 0.0  ;;  %v428_v52 = vmul.f32 %v383_v38, %v383_v38  ;;  %v410_v56 = vsel %vm261_vm0, %v383_v38, 0.0 }
  0xef   : > { %v433_v45 = vsel %vm261_vm0, %v424_v41, 0.0  ;;  %v429_v60 = vmul.f32 %v388_v36, %v388_v36  ;;  %v412_v0 = vsel %vm261_vm0, %v388_v36, 0.0 }
  0xf0   : > { %v434_v47 = vadd.f32 %v433_v45, %v432_v37  ;;  %v405_v48 = vadd.f32 %v404_v44, %v403_v43  ;;  %v441_v61 = vsel %vm261_vm0, %v428_v52, 0.0 }
  0xf1   : > { %v443_v3 = vsel %vm261_vm0, %v429_v60, 0.0 }
  0xf2   : > { %v407_v53 = vadd.f32 %v406_v46, %v405_v48  ;;  %v436_v54 = vadd.f32 %v435_v49, %v434_v47 }
  0xf4   : > { %v438_v57 = vadd.f32 %v437_v51, %v436_v54  ;;  %v409_v58 = vadd.f32 %v408_v55, %v407_v53 }
  0xf6   : > { %v411_v62 = vadd.f32 %v410_v56, %v409_v58  ;;  %v440_v63 = vadd.f32 %v439_v59, %v438_v57 }
  0xf8   : > { %v413_v1 = vadd.f32 %v412_v0, %v411_v62  ;;  %v442_v2 = vadd.f32 %v441_v61, %v440_v63 }
  0xfa   : > { %v414_v4 = vrot.slane %v413_v1, 4  ;;  %v444_v5 = vadd.f32 %v443_v3, %v442_v2 }
  0xfc   : > { %v415_v6 = vadd.f32 %v414_v4, %v413_v1  ;;  %v445_v7 = vrot.slane %v444_v5, 4 }
  0xfe   : > { %v416_v8 = vrot.slane %v415_v6, 2  ;;  %v446_v9 = vadd.f32 %v445_v7, %v444_v5 }
 0x100   : > { %v417_v10 = vadd.f32 %v416_v8, %v415_v6  ;;  %v447_v11 = vrot.slane %v446_v9, 2 }
 0x102   : > { %v418_v12 = vrot.slane %v417_v10, 1  ;;  %v448_v13 = vadd.f32 %v447_v11, %v446_v9 }
 0x104   : > { %v419_v14 = vadd.f32 %v418_v12, %v417_v10  ;;  %v449_v15 = vrot.slane %v448_v13, 1 }
 0x106   : > { %421 = vst.msk [vmem:[%s238_s14] sm:$0x1] %vm420_vm1, %v419_v14  ;;  %v450_v16 = vadd.f32 %v449_v15, %v448_v13 }
 0x108   : > { %451 = vst.msk [vmem:[%s241_s17] sm:$0x1] %vm420_vm1, %v450_v16 }
 0x109 PF: > { %s16_s18 = sadd.s32 1, %s637_s18  }
 0x10a   : > { %p13_p4 = scmp.ge.s32.totalorder %s16_s18, 4  }
 0x10c   :  { %15 = sbr.rel (!%p13_p4) target bundleno = 1 (0x1), region = 86 }

// kernel: fpn_forward_pallas.8
= control target key start
LH: loop header
LB: loop body
LE: loop exit
PB: predicated region body
PF: predicated region fallthrough
CT: control target
= control target key end

     0   :  { %s695_s18 = smov 0   ;;  %s859_s0 = inlined_call_operand.vmem [shape: f32[2,64,144], index: 0, kind: input, shape index: {}]   ;;  %s860_s1 = inlined_call_operand.vmem [shape: f32[144,32], index: 1, kind: input, shape index: {}]   ;;  %s861_s2 = inlined_call_operand.vmem [shape: f32[1,32], index: 2, kind: input, shape index: {}]   ;;  %s862_s3 = inlined_call_operand.vmem [shape: f32[2,64,32], index: 3, kind: output, shape index: {0}]   ;;  %s863_s4 = inlined_call_operand.vmem [shape: f32[2,1,32], index: 4, kind: output, shape index: {1}]   ;;  %s864_s5 = inlined_call_operand.vmem [shape: f32[2,1,32], index: 5, kind: output, shape index: {2}]  }
   0x1 LB: > { %s580_s19 = sadd.s32 4294967295, %s662_s18   ;;  %p584_p0 = scmp.ge.s32.totalorder %s662_s18, 1  ;;  %s662_s18 = sphi %s695_s18, %s16_s18  }
   0x2   : > { %p192_p1 = scmp.lt.s32.totalorder %s662_s18, 3 }
   0x4   : > { %p193_p2 = pnand %p584_p0, %p192_p1 }
   0x5   : > { %v258_v0 = vld [vmem:[%s860_s1] sm:$0xff] (!%p193_p2)  ;;  %v259_v1 = vld [vmem:[%s860_s1 + $0x8] sm:$0xff] (!%p193_p2)  ;;  %v260_v2 = vld [vmem:[%s860_s1 + $0x10] sm:$0xff] (!%p193_p2)  ;;  %p226_p3 = scmp.lt.s32.totalorder (!%p193_p2), %s580_s19, 1  ;;  %v664_v3 = vmov (!%p193_p2), 0.0|0.0   ;;  %vm283_vm0 = vcmask (!%p193_p2), 130048  }
   0x6   : > { %196 = sbr.rel (%p193_p2) target bundleno = 295 (0x127), region = 32  ;;  %602 = vmatprep.subr.bf16.mxu0 (!%p193_p2), %v664_v3  ;;  %v603_v4 = vpack.c.bf16 (!%p193_p2), %v259_v1, %v258_v0  ;;  %v261_v5 = vld [vmem:[%s860_s1 + $0x18] sm:$0xff] (!%p193_p2)  ;;  %629 = vmatprep.subr.bf16.mxu1 (!%p193_p2), %v664_v3  ;;  %v262_v7 = vld [vmem:[%s860_s1 + $0x20] sm:$0xff] (!%p193_p2)  ;;  %v263_v8 = vld [vmem:[%s860_s1 + $0x28] sm:$0xff] (!%p193_p2)  ;;  %vm413_vm1 = vcmask (!%p193_p2), 261120   ;;  %vm443_vm2 = vcmask (!%p193_p2), 253952  }
   0x7   : > { %v606_v6 = vpack.c.bf16 (!%p193_p2), %v261_v5, %v260_v2  ;;  %v609_v10 = vpack.c.bf16 (!%p193_p2), %v263_v8, %v262_v7  ;;  %v264_v12 = vld [vmem:[%s860_s1 + $0x30] sm:$0xff] (!%p193_p2)  ;;  %v265_v13 = vld [vmem:[%s860_s1 + $0x38] sm:$0xff] (!%p193_p2)  ;;  %v266_v15 = vld [vmem:[%s860_s1 + $0x40] sm:$0xff] (!%p193_p2) }
   0x8   : > { %604 = vmatpush1.bf16.msra.mxu0 (!%p193_p2), %v603_v4  ;;  %638 = vmatpush1.bf16.msra.mxu1 (!%p193_p2), %v603_v4  ;;  %v612_v14 = vpack.c.bf16 (!%p193_p2), %v265_v13, %v264_v12  ;;  %v267_v16 = vld [vmem:[%s860_s1 + $0x48] sm:$0xff] (!%p193_p2)  ;;  %v268_v18 = vld [vmem:[%s860_s1 + $0x50] sm:$0xff] (!%p193_p2)  ;;  %v269_v19 = vld [vmem:[%s860_s1 + $0x58] sm:$0xff] (!%p193_p2) }
   0x9   : > { %605 = vmatprep.subr.bf16.mxu0 (!%p193_p2), %v664_v3  ;;  %630 = vmatprep.subr.bf16.mxu1 (!%p193_p2), %v664_v3  ;;  %v615_v17 = vpack.c.bf16 (!%p193_p2), %v267_v16, %v266_v15  ;;  %v618_v20 = vpack.c.bf16 (!%p193_p2), %v269_v19, %v268_v18  ;;  %v270_v21 = vld [vmem:[%s860_s1 + $0x60] sm:$0xff] (!%p193_p2)  ;;  %v271_v22 = vld [vmem:[%s860_s1 + $0x68] sm:$0xff] (!%p193_p2)  ;;  %v272_v24 = vld [vmem:[%s860_s1 + $0x70] sm:$0xff] (!%p193_p2) }
   0xa   : > { %v621_v23 = vpack.c.bf16 (!%p193_p2), %v271_v22, %v270_v21  ;;  %v273_v25 = vld [vmem:[%s860_s1 + $0x78] sm:$0xff] (!%p193_p2)  ;;  %v274_v27 = vld [vmem:[%s860_s1 + $0x80] sm:$0xff] (!%p193_p2)  ;;  %v275_v28 = vld [vmem:[%s860_s1 + $0x88] sm:$0xff] (!%p193_p2) }
   0xb   : > { %v624_v26 = vpack.c.bf16 (!%p193_p2), %v273_v25, %v272_v24  ;;  %v627_v29 = vpack.c.bf16 (!%p193_p2), %v275_v28, %v274_v27  ;;  %v589_v44 = vld [vmem:[%s861_s2] ss:$0 sm:$0xff] (!%p193_p2) }
   0xc   : > { %607 = vmatpush1.bf16.msra.mxu0 (!%p193_p2), %v606_v6  ;;  %639 = vmatpush1.bf16.msra.mxu1 (!%p193_p2), %v606_v6 }
   0xd   : > { %s866_s19 = smov (!%p226_p3, %s580_s19), 1  ;;  %608 = vmatprep.subr.bf16.mxu0 %v664_v3  ;;  %631 = vmatprep.subr.bf16.mxu1 %v664_v3 }
   0xe   : > { %s600_s7 = sshll.u32 %s866_s19, 7  ;;  %s601_s13 = sshll.u32 %s866_s19, 6 }
   0xf   : > { %s731_s10 = scalar_lea.vmem %s859_s0, %s600_s7  ;;  %s814_s20 = scalar_lea.vmem %s862_s3, %s601_s13 }
  0x10   : > { %v243_v9 = vld [vmem:[%s731_s10 + $0x8] sm:$0xff]  ;;  %610 = vmatpush1.bf16.msra.mxu0 %v609_v10  ;;  %640 = vmatpush1.bf16.msra.mxu1 %v609_v10  ;;  %v242_v30 = vld [vmem:[%s731_s10] sm:$0xff]  ;;  %v245_v32 = vld [vmem:[%s731_s10 + $0x18] sm:$0xff]  ;;  %s238_s22 = scalar_lea.vmem %s863_s4, %s866_s19  ;;  %s241_s25 = scalar_lea.vmem %s864_s5, %s866_s19 }
  0x11   : > { %v251_v11 = vld [vmem:[%s731_s10 + $0x48] sm:$0xff]  ;;  %590 = vmatprep.mubr.msk.f32.mxu0 %vm283_vm0, %v243_v9  ;;  %611 = vmatprep.subr.bf16.mxu0 %v664_v3  ;;  %v250_v31 = vld [vmem:[%s731_s10 + $0x40] sm:$0xff]  ;;  %v253_v33 = vld [vmem:[%s731_s10 + $0x58] sm:$0xff] }
  0x12   : > { %594 = vmatprep.mubr.msk.f32.mxu1 %vm283_vm0, %v251_v11  ;;  %632 = vmatprep.subr.bf16.mxu1 %v664_v3  ;;  %v244_v34 = vld [vmem:[%s731_s10 + $0x10] sm:$0xff]  ;;  %v247_v36 = vld [vmem:[%s731_s10 + $0x28] sm:$0xff]  ;;  %v246_v38 = vld [vmem:[%s731_s10 + $0x20] sm:$0xff] }
  0x13   : > { %v252_v35 = vld [vmem:[%s731_s10 + $0x50] sm:$0xff]  ;;  %v255_v37 = vld [vmem:[%s731_s10 + $0x68] sm:$0xff]  ;;  %v254_v39 = vld [vmem:[%s731_s10 + $0x60] sm:$0xff] }
  0x14   : > { %613 = vmatpush1.bf16.msra.mxu0 %v612_v14  ;;  %641 = vmatpush1.bf16.msra.mxu1 %v612_v14  ;;  %v249_v40 = vld [vmem:[%s731_s10 + $0x38] sm:$0xff]  ;;  %v248_v42 = vld [vmem:[%s731_s10 + $0x30] sm:$0xff] }
  0x15   : > { %614 = vmatprep.subr.bf16.mxu0 %v664_v3  ;;  %633 = vmatprep.subr.bf16.mxu1 %v664_v3  ;;  %v257_v41 = vld [vmem:[%s731_s10 + $0x78] sm:$0xff]  ;;  %v256_v43 = vld [vmem:[%s731_s10 + $0x70] sm:$0xff] }
  0x18   : > { %616 = vmatpush1.bf16.msra.mxu0 %v615_v17  ;;  %642 = vmatpush1.bf16.msra.mxu1 %v615_v17 }
  0x19   : > { %617 = vmatprep.subr.bf16.mxu0 %v664_v3  ;;  %634 = vmatprep.subr.bf16.mxu1 %v664_v3 }
  0x1c   : > { %619 = vmatpush1.bf16.msra.mxu0 %v618_v20  ;;  %643 = vmatpush1.bf16.msra.mxu1 %v618_v20 }
  0x1d   : > { %620 = vmatprep.subr.bf16.mxu0 %v664_v3  ;;  %635 = vmatprep.subr.bf16.mxu1 %v664_v3 }
  0x20   : > { %622 = vmatpush1.bf16.msra.mxu0 %v621_v23  ;;  %644 = vmatpush1.bf16.msra.mxu1 %v621_v23 }
  0x21   : > { %623 = vmatprep.subr.bf16.mxu0 %v664_v3  ;;  %636 = vmatprep.subr.bf16.mxu1 %v664_v3 }
  0x24   : > { %625 = vmatpush1.bf16.msra.mxu0 %v624_v26  ;;  %645 = vmatpush1.bf16.msra.mxu1 %v624_v26 }
  0x25   : > { %626 = vmatprep.subr.bf16.mxu0 %v664_v3  ;;  %637 = vmatprep.subr.bf16.mxu1 %v664_v3 }
  0x28   : > { %628 = vmatpush1.bf16.msra.mxu0 %v627_v29  ;;  %646 = vmatpush1.bf16.msra.mxu1 %v627_v29 }
  0x2b   : > { %373 = vmatmul.mubr.f32.vlgmr.msra.gmra.mrb[0].mxu0 %v242_v30  ;;  %393 = vmatmul.mubr.f32.vlgmr.msra.gmra.mrb[0].mxu1 %v250_v31 }
  0x2c   : > { %591 = vmatprep.mubr.msk.f32.mxu0 %vm283_vm0, %v245_v32  ;;  %595 = vmatprep.mubr.msk.f32.mxu1 %vm283_vm0, %v253_v33 }
  0x2f   : > { %378 = vmatmul.mubr.f32.gmra.mrb[2].mxu0 %v244_v34  ;;  %398 = vmatmul.mubr.f32.gmra.mrb[2].mxu1 %v252_v35 }
  0x30   : > { %592 = vmatprep.mubr.msk.f32.mxu0 %vm283_vm0, %v247_v36  ;;  %596 = vmatprep.mubr.msk.f32.mxu1 %vm283_vm0, %v255_v37 }
  0x33   : > { %383 = vmatmul.mubr.f32.gmra.mrb[4].mxu0 %v246_v38  ;;  %403 = vmatmul.mubr.f32.gmra.mrb[4].mxu1 %v254_v39 }
  0x34   : > { %593 = vmatprep.mubr.msk.f32.mxu0 %vm283_vm0, %v249_v40  ;;  %597 = vmatprep.mubr.msk.f32.mxu1 %vm283_vm0, %v257_v41 }
  0x37   : > { %388 = vmatmul.mubr.f32.gmra.mrb[6].mxu0 %v248_v42  ;;  %408 = vmatmul.mubr.f32.gmra.mrb[6].mxu1 %v256_v43 }
  0xfe   : > { %v374_v45 = vpop.f32.mrb[0].mxu0  ;;  %v394_v46 = vpop.f32.mrb[0].mxu1 }
  0xff   : > { %v375_v47 = vadd.f32 %v589_v44, %v374_v45  ;;  %v376_v48 = vpop.f32.mrb[1].mxu0  ;;  %v395_v49 = vadd.f32 %v589_v44, %v394_v46  ;;  %v396_v50 = vpop.f32.mrb[1].mxu1 }
 0x101   : > { %414 = vst.msk [vmem:[%s814_s20] sm:$0xff] %vm413_vm1, %v375_v47  ;;  %418 = vst.msk [vmem:[%s814_s20 + $0x20] sm:$0xff] %vm413_vm1, %v395_v49  ;;  %v445_v53 = vmul.f32 %v375_v47, %v375_v47  ;;  %v422_v58 = vsel %vm413_vm1, %v375_v47, 0.0  ;;  %v449_v18 = vmul.f32 %v395_v49, %v395_v49  ;;  %v429_v22 = vsel %vm413_vm1, %v395_v49, 0.0 }
 0x102   : > { %v379_v51 = vpop.f32.mrb[2].mxu0  ;;  %v399_v52 = vpop.f32.mrb[2].mxu1 }
 0x103   : > { %v380_v54 = vadd.f32 %v589_v44, %v379_v51  ;;  %v381_v55 = vpop.f32.mrb[3].mxu0  ;;  %v400_v56 = vadd.f32 %v589_v44, %v399_v52  ;;  %v401_v57 = vpop.f32.mrb[3].mxu1  ;;  %v453_v0 = vsel %vm413_vm1, %v445_v53, 0.0  ;;  %v460_v27 = vsel %vm413_vm1, %v449_v18, 0.0 }
 0x105   : > { %415 = vst.msk [vmem:[%s814_s20 + $0x8] sm:$0xff] %vm413_vm1, %v380_v54  ;;  %v423_v59 = vsel %vm413_vm1, %v380_v54, 0.0  ;;  %v446_v60 = vmul.f32 %v380_v54, %v380_v54  ;;  %419 = vst.msk [vmem:[%s814_s20 + $0x28] sm:$0xff] %vm413_vm1, %v400_v56  ;;  %v450_v23 = vmul.f32 %v400_v56, %v400_v56  ;;  %v431_v28 = vsel %vm413_vm1, %v400_v56, 0.0 }
 0x106   : > { %v424_v61 = vadd.f32 %v423_v59, %v422_v58  ;;  %v384_v62 = vpop.f32.mrb[4].mxu0  ;;  %v404_v63 = vpop.f32.mrb[4].mxu1 }
 0x107   : > { %v454_v1 = vsel %vm413_vm1, %v446_v60, 0.0  ;;  %v385_v2 = vadd.f32 %v589_v44, %v384_v62  ;;  %v386_v3 = vpop.f32.mrb[5].mxu0  ;;  %v405_v4 = vadd.f32 %v589_v44, %v404_v63  ;;  %v406_v5 = vpop.f32.mrb[5].mxu1  ;;  %v462_v33 = vsel %vm413_vm1, %v450_v23, 0.0 }
 0x108   : > { %v455_v6 = vadd.f32 %v454_v1, %v453_v0 }
 0x109   : > { %416 = vst.msk [vmem:[%s814_s20 + $0x10] sm:$0xff] %vm413_vm1, %v385_v2  ;;  %v425_v7 = vsel %vm413_vm1, %v385_v2, 0.0  ;;  %v447_v8 = vmul.f32 %v385_v2, %v385_v2  ;;  %420 = vst.msk [vmem:[%s814_s20 + $0x30] sm:$0xff] %vm413_vm1, %v405_v4  ;;  %v451_v29 = vmul.f32 %v405_v4, %v405_v4  ;;  %v433_v34 = vsel %vm413_vm1, %v405_v4, 0.0 }
 0x10a   : > { %v426_v9 = vadd.f32 %v425_v7, %v424_v61  ;;  %v389_v10 = vpop.f32.mrb[6].mxu0  ;;  %v409_v11 = vpop.f32.mrb[6].mxu1 }
 0x10b   : > { %v456_v12 = vsel %vm413_vm1, %v447_v8, 0.0  ;;  %v390_v13 = vadd.f32 %v589_v44, %v389_v10  ;;  %v391_v14 = vpop.f32.mrb[7].mxu0  ;;  %v410_v15 = vadd.f32 %v589_v44, %v409_v11  ;;  %v411_v16 = vpop.f32.mrb[7].mxu1  ;;  %v464_v38 = vsel %vm413_vm1, %v451_v29, 0.0 }
 0x10c   : > { %v457_v17 = vadd.f32 %v456_v12, %v455_v6 }
 0x10d   : > { %417 = vst.msk [vmem:[%s814_s20 + $0x18] sm:$0xff] %vm413_vm1, %v390_v13  ;;  %v427_v19 = vsel %vm413_vm1, %v390_v13, 0.0  ;;  %v448_v20 = vmul.f32 %v390_v13, %v390_v13  ;;  %421 = vst.msk [vmem:[%s814_s20 + $0x38] sm:$0xff] %vm413_vm1, %v410_v15  ;;  %v452_v30 = vmul.f32 %v410_v15, %v410_v15  ;;  %v435_v35 = vsel %vm413_vm1, %v410_v15, 0.0 }
 0x10e   : > { %v428_v21 = vadd.f32 %v427_v19, %v426_v9 }
 0x10f   : > { %v458_v24 = vsel %vm413_vm1, %v448_v20, 0.0  ;;  %v466_v39 = vsel %vm413_vm1, %v452_v30, 0.0 }
 0x110   : > { %v430_v25 = vadd.f32 %v429_v22, %v428_v21  ;;  %v459_v26 = vadd.f32 %v458_v24, %v457_v17 }
 0x112   : > { %v461_v31 = vadd.f32 %v460_v27, %v459_v26  ;;  %v432_v32 = vadd.f32 %v431_v28, %v430_v25 }
 0x114   : > { %v434_v36 = vadd.f32 %v433_v34, %v432_v32  ;;  %v463_v37 = vadd.f32 %v462_v33, %v461_v31 }
 0x116   : > { %v465_v40 = vadd.f32 %v464_v38, %v463_v37  ;;  %v436_v41 = vadd.f32 %v435_v35, %v434_v36 }
 0x118   : > { %v437_v42 = vrot.slane %v436_v41, 4  ;;  %v467_v43 = vadd.f32 %v466_v39, %v465_v40 }
 0x11a   : > { %v438_v44 = vadd.f32 %v437_v42, %v436_v41  ;;  %v468_v45 = vrot.slane %v467_v43, 4 }
 0x11c   : > { %v439_v46 = vrot.slane %v438_v44, 2  ;;  %v469_v47 = vadd.f32 %v468_v45, %v467_v43 }
 0x11e   : > { %v440_v48 = vadd.f32 %v439_v46, %v438_v44  ;;  %v470_v49 = vrot.slane %v469_v47, 2 }
 0x120   : > { %v441_v50 = vrot.slane %v440_v48, 1  ;;  %v471_v51 = vadd.f32 %v470_v49, %v469_v47 }
 0x122   : > { %v442_v52 = vadd.f32 %v441_v50, %v440_v48  ;;  %v472_v53 = vrot.slane %v471_v51, 1 }
 0x124   : > { %444 = vst.msk [vmem:[%s238_s22] sm:$0x1] %vm443_vm2, %v442_v52  ;;  %v473_v54 = vadd.f32 %v472_v53, %v471_v51 }
 0x126   : > { %474 = vst.msk [vmem:[%s241_s25] sm:$0x1] %vm443_vm2, %v473_v54 }
 0x127 PF: > { %s16_s18 = sadd.s32 1, %s662_s18  }
 0x128   : > { %p13_p4 = scmp.ge.s32.totalorder %s16_s18, 4  }
 0x12a   :  { %15 = sbr.rel (!%p13_p4) target bundleno = 1 (0x1), region = 86 }

// kernel: fpn_forward_pallas.11
= control target key start
LH: loop header
LB: loop body
LE: loop exit
PB: predicated region body
PF: predicated region fallthrough
CT: control target
= control target key end

     0   :  { %s735_s18 = smov 0   ;;  %s885_s0 = inlined_call_operand.vmem [shape: f32[2,16,288], index: 0, kind: input, shape index: {}]   ;;  %s886_s1 = inlined_call_operand.vmem [shape: f32[288,64], index: 1, kind: input, shape index: {}]   ;;  %s887_s2 = inlined_call_operand.vmem [shape: f32[1,64], index: 2, kind: input, shape index: {}]   ;;  %s888_s3 = inlined_call_operand.vmem [shape: f32[2,16,64], index: 3, kind: output, shape index: {0}]   ;;  %s889_s4 = inlined_call_operand.vmem [shape: f32[2,1,64], index: 4, kind: output, shape index: {1}]   ;;  %s890_s5 = inlined_call_operand.vmem [shape: f32[2,1,64], index: 5, kind: output, shape index: {2}]  }
   0x1 LB: > { %s579_s19 = sadd.s32 4294967295, %s703_s18   ;;  %p583_p0 = scmp.ge.s32.totalorder %s703_s18, 1  ;;  %s703_s18 = sphi %s735_s18, %s16_s18  }
   0x2   : > { %p192_p1 = scmp.lt.s32.totalorder %s703_s18, 3 }
   0x4   : > { %p193_p2 = pnand %p583_p0, %p192_p1 }
   0x5   : > { %v264_v0 = vld [vmem:[%s886_s1 + $0x80] sm:$0xff] (!%p193_p2)  ;;  %v265_v1 = vld [vmem:[%s886_s1 + $0x88] sm:$0xff] (!%p193_p2)  ;;  %p226_p3 = scmp.lt.s32.totalorder (!%p193_p2), %s579_s19, 1  ;;  %v266_v5 = vld [vmem:[%s886_s1 + $0x90] sm:$0xff] (!%p193_p2)  ;;  %vm291_vm0 = vcmask (!%p193_p2), 261120   ;;  %vm448_vm1 = vcmask (!%p193_p2), 523264  }
   0x6   : > { %196 = sbr.rel (%p193_p2) target bundleno = 281 (0x119), region = 32  ;;  %v248_v2 = vld [vmem:[%s886_s1] sm:$0xff] (!%p193_p2)  ;;  %v648_v3 = vpack.c.bf16 (!%p193_p2), %v265_v1, %v264_v0  ;;  %v249_v4 = vld [vmem:[%s886_s1 + $0x8] sm:$0xff] (!%p193_p2)  ;;  %v267_v6 = vld [vmem:[%s886_s1 + $0x98] sm:$0xff] (!%p193_p2)  ;;  %vm460_vm2 = vcmask (!%p193_p2), 516096  }
   0x7   : > { %v650_v7 = vpack.c.bf16 (!%p193_p2), %v249_v4, %v248_v2  ;;  %v652_v8 = vpack.c.bf16 (!%p193_p2), %v267_v6, %v266_v5  ;;  %v250_v9 = vld [vmem:[%s886_s1 + $0x10] sm:$0xff] (!%p193_p2)  ;;  %v251_v10 = vld [vmem:[%s886_s1 + $0x18] sm:$0xff] (!%p193_p2)  ;;  %v268_v11 = vld [vmem:[%s886_s1 + $0xa0] sm:$0xff] (!%p193_p2) }
   0x8   : > { %649 = vmatprep.subr.bf16.mxu0 (!%p193_p2), %v648_v3  ;;  %v269_v12 = vld [vmem:[%s886_s1 + $0xa8] sm:$0xff] (!%p193_p2)  ;;  %v654_v13 = vpack.c.bf16 (!%p193_p2), %v251_v10, %v250_v9  ;;  %v252_v15 = vld [vmem:[%s886_s1 + $0x20] sm:$0xff] (!%p193_p2)  ;;  %v270_v17 = vld [vmem:[%s886_s1 + $0xb0] sm:$0xff] (!%p193_p2) }
   0x9   : > { %651 = vmatpush3.bf16.msra.mxu0 (!%p193_p2), %v650_v7  ;;  %v656_v14 = vpack.c.bf16 (!%p193_p2), %v269_v12, %v268_v11  ;;  %v253_v16 = vld [vmem:[%s886_s1 + $0x28] sm:$0xff] (!%p193_p2)  ;;  %v271_v18 = vld [vmem:[%s886_s1 + $0xb8] sm:$0xff] (!%p193_p2)  ;;  %v254_v21 = vld [vmem:[%s886_s1 + $0x30] sm:$0xff] (!%p193_p2) }
   0xa   : > { %653 = vmatprep.subr.bf16.mxu0 (!%p193_p2), %v652_v8  ;;  %v658_v19 = vpack.c.bf16 (!%p193_p2), %v253_v16, %v252_v15  ;;  %v660_v20 = vpack.c.bf16 (!%p193_p2), %v271_v18, %v270_v17  ;;  %v255_v22 = vld [vmem:[%s886_s1 + $0x38] sm:$0xff] (!%p193_p2)  ;;  %v272_v23 = vld [vmem:[%s886_s1 + $0xc0] sm:$0xff] (!%p193_p2)  ;;  %v273_v24 = vld [vmem:[%s886_s1 + $0xc8] sm:$0xff] (!%p193_p2) }
   0xb   : > { %v280_v25 = vld [vmem:[%s886_s1 + $0x100] sm:$0xff] (!%p193_p2)  ;;  %v281_v26 = vld [vmem:[%s886_s1 + $0x108] sm:$0xff] (!%p193_p2)  ;;  %v662_v29 = vpack.c.bf16 (!%p193_p2), %v255_v22, %v254_v21  ;;  %v282_v30 = vld [vmem:[%s886_s1 + $0x110] sm:$0xff] (!%p193_p2)  ;;  %v664_v32 = vpack.c.bf16 (!%p193_p2), %v273_v24, %v272_v23 }
   0xc   : > { %v680_v27 = vpack.c.bf16 (!%p193_p2), %v281_v26, %v280_v25  ;;  %v283_v31 = vld [vmem:[%s886_s1 + $0x118] sm:$0xff] (!%p193_p2)  ;;  %v256_v33 = vld [vmem:[%s886_s1 + $0x40] sm:$0xff] (!%p193_p2)  ;;  %v257_v34 = vld [vmem:[%s886_s1 + $0x48] sm:$0xff] (!%p193_p2) }
   0xd   : > { %s892_s19 = smov (!%p226_p3, %s579_s19), 1  ;;  %655 = vmatpush3.bf16.msra.mxu0 %v654_v13  ;;  %v684_v35 = vpack.c.bf16 %v283_v31, %v282_v30  ;;  %v274_v37 = vld [vmem:[%s886_s1 + $0xd0] sm:$0xff]  ;;  %v275_v38 = vld [vmem:[%s886_s1 + $0xd8] sm:$0xff]  ;;  %v666_v39 = vpack.c.bf16 %v257_v34, %v256_v33  ;;  %v276_v43 = vld [vmem:[%s886_s1 + $0xe0] sm:$0xff] }
   0xe   : > { %s688_s15 = smul.u32 48, %s892_s19  ;;  %657 = vmatprep.subr.bf16.mxu0 %v656_v14  ;;  %681 = vmatprep.subr.bf16.mxu1 %v680_v27  ;;  %v668_v40 = vpack.c.bf16 %v275_v38, %v274_v37  ;;  %v258_v41 = vld [vmem:[%s886_s1 + $0x50] sm:$0xff]  ;;  %v259_v42 = vld [vmem:[%s886_s1 + $0x58] sm:$0xff]  ;;  %v277_v44 = vld [vmem:[%s886_s1 + $0xe8] sm:$0xff]  ;;  %s592_s6 = sshll.u32 %s892_s19, 4 }
   0xf   : > { %683 = vmatpush3.bf16.msra.mxu1 %v680_v27  ;;  %v670_v46 = vpack.c.bf16 %v259_v42, %v258_v41  ;;  %v672_v47 = vpack.c.bf16 %v277_v44, %v276_v43  ;;  %v260_v48 = vld [vmem:[%s886_s1 + $0x60] sm:$0xff]  ;;  %v261_v49 = vld [vmem:[%s886_s1 + $0x68] sm:$0xff]  ;;  %v278_v50 = vld [vmem:[%s886_s1 + $0xf0] sm:$0xff]  ;;  %s235_s9 = scalar_lea.vmem %s888_s3, %s592_s6  ;;  %s238_s11 = scalar_lea.vmem %s889_s4, %s892_s19 }
  0x10   : > { %s791_s28 = scalar_lea.vmem %s885_s0, %s688_s15  ;;  %685 = vmatprep.subr.bf16.mxu1 %v684_v35  ;;  %v279_v51 = vld [vmem:[%s886_s1 + $0xf8] sm:$0xff]  ;;  %v674_v52 = vpack.c.bf16 %v261_v49, %v260_v48  ;;  %v262_v54 = vld [vmem:[%s886_s1 + $0x70] sm:$0xff]  ;;  %v587_v0 = vld [vmem:[%s887_s2] ss:$0 sm:$0xff]  ;;  %s241_s14 = scalar_lea.vmem %s890_s5, %s892_s19 }
  0x11   : > { %v243_v28 = vld [vmem:[%s791_s28 + $0x8] sm:$0xff]  ;;  %659 = vmatpush3.bf16.msra.mxu0 %v658_v19  ;;  %v244_v36 = vld [vmem:[%s791_s28 + $0x10] sm:$0xff]  ;;  %v676_v53 = vpack.c.bf16 %v279_v51, %v278_v50  ;;  %v263_v55 = vld [vmem:[%s886_s1 + $0x78] sm:$0xff] }
  0x12   : > { %362 = vmatprep.mubr.f32.mxu0 %v243_v28  ;;  %661 = vmatprep.subr.bf16.mxu0 %v660_v20  ;;  %v247_v45 = vld [vmem:[%s791_s28 + $0x28] sm:$0xff]  ;;  %v678_v56 = vpack.c.bf16 %v263_v55, %v262_v54  ;;  %v242_v57 = vld [vmem:[%s791_s28] sm:$0xff]  ;;  %v245_v59 = vld [vmem:[%s791_s28 + $0x18] sm:$0xff] }
  0x13   : > { %645 = vmatprep.mubr.msk.f32.mxu1 %vm291_vm0, %v244_v36  ;;  %687 = vmatpush3.bf16.msra.mxu1 %v684_v35  ;;  %v246_v58 = vld [vmem:[%s791_s28 + $0x20] sm:$0xff] }
  0x15   : > { %663 = vmatpush3.bf16.msra.mxu0 %v662_v29 }
  0x16   : > { %665 = vmatprep.subr.bf16.mxu0 %v664_v32  ;;  %646 = vmatmul.mubr.msk.f32.vlgmr.msra.gmra.mrb[0].mxu1 %vm291_vm0, %v247_v45 }
  0x19   : > { %667 = vmatpush3.bf16.msra.mxu0 %v666_v39 }
  0x1a   : > { %669 = vmatprep.subr.bf16.mxu0 %v668_v40 }
  0x1d   : > { %671 = vmatpush3.bf16.msra.mxu0 %v670_v46 }
  0x1e   : > { %673 = vmatprep.subr.bf16.mxu0 %v672_v47 }
  0x21   : > { %675 = vmatpush3.bf16.msra.mxu0 %v674_v52 }
  0x22   : > { %677 = vmatprep.subr.bf16.mxu0 %v676_v53 }
  0x25   : > { %679 = vmatpush3.bf16.msra.mxu0 %v678_v56 }
  0x28   : > { %363 = vmatmul.mubr.f32.vlgmr.msra.gmra.mrb[0].mxu0 %v242_v57 }
  0x29   : > { %367 = vmatprep.mubr.f32.mxu0 %v246_v58 }
  0x2c   : > { %368 = vmatmul.mubr.f32.gmra.mrb[2].mxu0 %v245_v59 }
  0xe9   : > { %v647_v60 = vpop.f32.mrb[0].mxu1 }
  0xea   : > { %v439_v61 = vpop.f32.mrb[1].mxu1 }
  0xfb   : > { %v625_v62 = vpop.f32.mrb[0].mxu0 }
  0xfc   : > { %v626_v63 = vpop.f32.mrb[1].mxu0 }
  0xfd   : > { %v627_v1 = vadd.f32 %v626_v63, %v625_v62 }
  0xff   : > { %v628_v2 = vpop.f32.mrb[2].mxu0  ;;  %v365_v3 = vadd.f32 %v627_v1, %v587_v0 }
 0x100   : > { %v629_v4 = vpop.f32.mrb[3].mxu0 }
 0x101   : > { %v630_v5 = vadd.f32 %v629_v4, %v628_v2  ;;  %v440_v6 = vadd.f32 %v439_v61, %v365_v3 }
 0x103   : > { %v370_v7 = vadd.f32 %v630_v5, %v587_v0  ;;  %449 = vst.msk [vmem:[%s235_s9] sm:$0xff] %vm448_vm1, %v440_v6  ;;  %v462_v9 = vmul.f32 %v440_v6, %v440_v6  ;;  %v451_v11 = vsel %vm448_vm1, %v440_v6, 0.0 }
 0x105   : > { %v445_v8 = vadd.f32 %v647_v60, %v370_v7  ;;  %v464_v14 = vsel %vm448_vm1, %v462_v9, 0.0 }
 0x107   : > { %v463_v10 = vmul.f32 %v445_v8, %v445_v8  ;;  %450 = vst.msk [vmem:[%s235_s9 + $0x8] sm:$0xff] %vm448_vm1, %v445_v8  ;;  %v452_v12 = vsel %vm448_vm1, %v445_v8, 0.0 }
 0x108   : > { %v453_v13 = vadd.f32 %v452_v12, %v451_v11 }
 0x109   : > { %v465_v15 = vsel %vm448_vm1, %v463_v10, 0.0 }
 0x10a   : > { %v454_v16 = vrot.slane %v453_v13, 4  ;;  %v466_v17 = vadd.f32 %v465_v15, %v464_v14 }
 0x10c   : > { %v455_v18 = vadd.f32 %v454_v16, %v453_v13  ;;  %v467_v19 = vrot.slane %v466_v17, 4 }
 0x10e   : > { %v456_v20 = vrot.slane %v455_v18, 2  ;;  %v468_v21 = vadd.f32 %v467_v19, %v466_v17 }
 0x110   : > { %v457_v22 = vadd.f32 %v456_v20, %v455_v18  ;;  %v469_v23 = vrot.slane %v468_v21, 2 }
 0x112   : > { %v458_v24 = vrot.slane %v457_v22, 1  ;;  %v470_v25 = vadd.f32 %v469_v23, %v468_v21 }
 0x114   : > { %v459_v26 = vadd.f32 %v458_v24, %v457_v22  ;;  %v471_v27 = vrot.slane %v470_v25, 1 }
 0x116   : > { %461 = vst.msk [vmem:[%s238_s11] sm:$0x1] %vm460_vm2, %v459_v26  ;;  %v472_v28 = vadd.f32 %v471_v27, %v470_v25 }
 0x118   : > { %473 = vst.msk [vmem:[%s241_s14] sm:$0x1] %vm460_vm2, %v472_v28 }
 0x119 PF: > { %s16_s18 = sadd.s32 1, %s703_s18  }
 0x11a   : > { %p13_p4 = scmp.ge.s32.totalorder %s16_s18, 4  }
 0x11c   :  { %15 = sbr.rel (!%p13_p4) target bundleno = 1 (0x1), region = 86 }

// kernel: fpn_forward_pallas.13
= control target key start
LH: loop header
LB: loop body
LE: loop exit
PB: predicated region body
PF: predicated region fallthrough
CT: control target
= control target key end

     0   :  { %s459_s21 = smov 0   ;;  %s491_s0 = inlined_call_operand.vmem [shape: f32[2,16,64], index: 0, kind: input, shape index: {}]   ;;  %s492_s1 = inlined_call_operand.vmem [shape: f32[1,64], index: 1, kind: input, shape index: {}]   ;;  %s493_s2 = inlined_call_operand.vmem [shape: f32[1,64], index: 2, kind: input, shape index: {}]   ;;  %s494_s3 = inlined_call_operand.vmem [shape: f32[2,16,64], index: 3, kind: input, shape index: {}]   ;;  %s495_s4 = inlined_call_operand.vmem [shape: f32[1,64], index: 4, kind: input, shape index: {}]   ;;  %s496_s5 = inlined_call_operand.vmem [shape: f32[1,64], index: 5, kind: input, shape index: {}]   ;;  %s497_s6 = inlined_call_operand.vmem [shape: f32[2,16,64], index: 6, kind: output, shape index: {}]  }
   0x1 LB: > { %s388_s22 = sadd.s32 4294967295, %s422_s21   ;;  %p392_p0 = scmp.ge.s32.totalorder %s422_s21, 1  ;;  %s422_s21 = sphi %s459_s21, %s16_s21  }
   0x2   : > { %p222_p1 = scmp.lt.s32.totalorder %s422_s21, 3 }
   0x4   : > { %p223_p2 = pnand %p392_p0, %p222_p1 }
   0x5   : > { %p257_p3 = scmp.lt.s32.totalorder (!%p223_p2), %s388_s22, 1  ;;  %v399_v0 = vld [vmem:[%s492_s1] ss:$0 sm:$0xff] (!%p223_p2)  ;;  %vm318_vm0 = vcmask (!%p223_p2), 523264  }
   0x6   : > { %226 = sbr.rel (%p223_p2) target bundleno = 27 (0x1b), region = 44  ;;  %v401_v1 = vld [vmem:[%s495_s4] ss:$0 sm:$0xff] (!%p223_p2) }
   0x7   : > { %v400_v2 = vld [vmem:[%s493_s2] ss:$0 sm:$0xff] (!%p223_p2) }
   0x8   : > { %v402_v3 = vld [vmem:[%s496_s5] ss:$0 sm:$0xff] (!%p223_p2) }
   0xd   : > { %s499_s22 = smov (!%p257_p3, %s388_s22), 1 }
   0xe   : > { %s405_s23 = sshll.u32 %s499_s22, 4 }
   0xf   : > { %s261_s30 = scalar_lea.vmem %s491_s0, %s405_s23  ;;  %s266_s9 = scalar_lea.vmem %s494_s3, %s405_s23 }
  0x10   : > { %v272_v4 = vld [vmem:[%s261_s30] sm:$0xff]  ;;  %v273_v5 = vld [vmem:[%s261_s30 + $0x8] sm:$0xff]  ;;  %s271_s16 = scalar_lea.vmem %s497_s6, %s405_s23 }
  0x11   : > { %v294_v6 = vld [vmem:[%s266_s9] sm:$0xff]  ;;  %v281_v7 = vmul.f32 %v399_v0, %v272_v4  ;;  %v282_v8 = vmul.f32 %v399_v0, %v273_v5  ;;  %v295_v9 = vld [vmem:[%s266_s9 + $0x8] sm:$0xff] }
  0x12   : > { %v303_v10 = vmul.f32 %v401_v1, %v294_v6  ;;  %v304_v11 = vmul.f32 %v401_v1, %v295_v9 }
  0x13   : > { %v290_v12 = vadd.f32 %v400_v2, %v281_v7  ;;  %v291_v14 = vadd.f32 %v400_v2, %v282_v8 }
  0x14   : > { %v312_v13 = vadd.f32 %v402_v3, %v303_v10  ;;  %v313_v15 = vadd.f32 %v402_v3, %v304_v11 }
  0x15   : > { %v292_v16 = vmax.f32 %v290_v12, 0.0  ;;  %v293_v18 = vmax.f32 %v291_v14, 0.0 }
  0x16   : > { %v314_v17 = vmax.f32 %v312_v13, 0.0  ;;  %v315_v19 = vmax.f32 %v313_v15, 0.0 }
  0x18   : > { %v316_v20 = vadd.f32 %v314_v17, %v292_v16  ;;  %v317_v21 = vadd.f32 %v315_v19, %v293_v18 }
  0x1a   : > { %319 = vst.msk [vmem:[%s271_s16] sm:$0xff] %vm318_vm0, %v316_v20  ;;  %320 = vst.msk [vmem:[%s271_s16 + $0x8] sm:$0xff] %vm318_vm0, %v317_v21 }
  0x1b PF: > { %s16_s21 = sadd.s32 1, %s422_s21  }
  0x1c   : > { %p13_p4 = scmp.ge.s32.totalorder %s16_s21, 4  }
  0x1e   :  { %15 = sbr.rel (!%p13_p4) target bundleno = 1 (0x1), region = 77 }

// kernel: fpn_forward_pallas.12
= control target key start
LH: loop header
LB: loop body
LE: loop exit
PB: predicated region body
PF: predicated region fallthrough
CT: control target
= control target key end

     0   :  { %s578_s18 = smov 0   ;;  %s641_s0 = inlined_call_operand.vmem [shape: f32[2,16,64], index: 0, kind: input, shape index: {}]   ;;  %s642_s1 = inlined_call_operand.vmem [shape: f32[64,64], index: 1, kind: input, shape index: {}]   ;;  %s643_s2 = inlined_call_operand.vmem [shape: f32[1,64], index: 2, kind: input, shape index: {}]   ;;  %s644_s3 = inlined_call_operand.vmem [shape: f32[2,16,64], index: 3, kind: output, shape index: {0}]   ;;  %s645_s4 = inlined_call_operand.vmem [shape: f32[2,1,64], index: 4, kind: output, shape index: {1}]   ;;  %s646_s5 = inlined_call_operand.vmem [shape: f32[2,1,64], index: 5, kind: output, shape index: {2}]  }
   0x1 LB: > { %s471_s19 = sadd.s32 4294967295, %s546_s18   ;;  %p475_p0 = scmp.ge.s32.totalorder %s546_s18, 1  ;;  %s546_s18 = sphi %s578_s18, %s16_s18  }
   0x2   : > { %p192_p1 = scmp.lt.s32.totalorder %s546_s18, 3 }
   0x4   : > { %p193_p2 = pnand %p475_p0, %p192_p1 }
   0x5   : > { %v244_v0 = vld [vmem:[%s642_s1] sm:$0xff] (!%p193_p2)  ;;  %v245_v1 = vld [vmem:[%s642_s1 + $0x8] sm:$0xff] (!%p193_p2)  ;;  %v246_v2 = vld [vmem:[%s642_s1 + $0x10] sm:$0xff] (!%p193_p2)  ;;  %p226_p3 = scmp.lt.s32.totalorder (!%p193_p2), %s471_s19, 1  ;;  %vm259_vm0 = vcmask (!%p193_p2), 523264   ;;  %vm352_vm1 = vcmask (!%p193_p2), 516096  }
   0x6   : > { %196 = sbr.rel (%p193_p2) target bundleno = 257 (0x101), region = 32  ;;  %v516_v3 = vpack.c.bf16 (!%p193_p2), %v245_v1, %v244_v0  ;;  %v247_v4 = vld [vmem:[%s642_s1 + $0x18] sm:$0xff] (!%p193_p2)  ;;  %v248_v6 = vld [vmem:[%s642_s1 + $0x20] sm:$0xff] (!%p193_p2)  ;;  %v249_v7 = vld [vmem:[%s642_s1 + $0x28] sm:$0xff] (!%p193_p2) }
   0x7   : > { %v520_v5 = vpack.c.bf16 (!%p193_p2), %v247_v4, %v246_v2  ;;  %v524_v8 = vpack.c.bf16 (!%p193_p2), %v249_v7, %v248_v6  ;;  %v250_v9 = vld [vmem:[%s642_s1 + $0x30] sm:$0xff] (!%p193_p2)  ;;  %v251_v10 = vld [vmem:[%s642_s1 + $0x38] sm:$0xff] (!%p193_p2)  ;;  %v480_v14 = vld [vmem:[%s643_s2] ss:$0 sm:$0xff] (!%p193_p2) }
   0x8   : > { %517 = vmatprep.subr.bf16.mxu0 (!%p193_p2), %v516_v3  ;;  %v528_v12 = vpack.c.bf16 (!%p193_p2), %v251_v10, %v250_v9 }
   0x9   : > { %519 = vmatpush3.bf16.msra.mxu0 (!%p193_p2), %v516_v3 }
   0xa   : > { %521 = vmatprep.subr.bf16.mxu0 (!%p193_p2), %v520_v5 }
   0xd   : > { %s648_s19 = smov (!%p226_p3, %s471_s19), 1  ;;  %523 = vmatpush3.bf16.msra.mxu0 %v520_v5 }
   0xe   : > { %s485_s7 = sshll.u32 %s648_s19, 4  ;;  %525 = vmatprep.subr.bf16.mxu0 %v524_v8  ;;  %s238_s24 = scalar_lea.vmem %s645_s4, %s648_s19 }
   0xf   : > { %s230_s10 = scalar_lea.vmem %s641_s0, %s485_s7  ;;  %s235_s21 = scalar_lea.vmem %s644_s3, %s485_s7 }
  0x10   : > { %v242_v11 = vld [vmem:[%s230_s10] sm:$0xff]  ;;  %v243_v13 = vld [vmem:[%s230_s10 + $0x8] sm:$0xff]  ;;  %s241_s27 = scalar_lea.vmem %s646_s5, %s648_s19 }
  0x11   : > { %513 = vmatprep.mubr.msk.f32.mxu0 %vm259_vm0, %v242_v11  ;;  %527 = vmatpush3.bf16.msra.mxu0 %v524_v8 }
  0x12   : > { %529 = vmatprep.subr.bf16.mxu0 %v528_v12 }
  0x15   : > { %531 = vmatpush3.bf16.msra.mxu0 %v528_v12 }
  0x18   : > { %514 = vmatmul.mubr.msk.f32.vlgmr.msra.gmra.mrb[0].mxu0 %vm259_vm0, %v243_v13 }
  0xeb   : > { %v515_v15 = vpop.f32.mrb[0].mxu0 }
  0xec   : > { %v338_v16 = vadd.f32 %v515_v15, %v480_v14  ;;  %v332_v17 = vpop.f32.mrb[1].mxu0 }
  0xed   : > { %v333_v18 = vadd.f32 %v480_v14, %v332_v17 }
  0xee   : > { %342 = vst.msk [vmem:[%s235_s21 + $0x8] sm:$0xff] %vm259_vm0, %v338_v16  ;;  %v344_v19 = vsel %vm259_vm0, %v338_v16, 0.0  ;;  %v355_v20 = vmul.f32 %v338_v16, %v338_v16 }
  0xef   : > { %341 = vst.msk [vmem:[%s235_s21] sm:$0xff] %vm259_vm0, %v333_v18  ;;  %v343_v21 = vsel %vm259_vm0, %v333_v18, 0.0  ;;  %v354_v22 = vmul.f32 %v333_v18, %v333_v18 }
  0xf0   : > { %v357_v23 = vsel %vm259_vm0, %v355_v20, 0.0  ;;  %v345_v24 = vadd.f32 %v344_v19, %v343_v21 }
  0xf1   : > { %v356_v25 = vsel %vm259_vm0, %v354_v22, 0.0 }
  0xf2   : > { %v346_v26 = vrot.slane %v345_v24, 4  ;;  %v358_v27 = vadd.f32 %v357_v23, %v356_v25 }
  0xf4   : > { %v347_v28 = vadd.f32 %v346_v26, %v345_v24  ;;  %v359_v29 = vrot.slane %v358_v27, 4 }
  0xf6   : > { %v348_v30 = vrot.slane %v347_v28, 2  ;;  %v360_v31 = vadd.f32 %v359_v29, %v358_v27 }
  0xf8   : > { %v349_v32 = vadd.f32 %v348_v30, %v347_v28  ;;  %v361_v33 = vrot.slane %v360_v31, 2 }
  0xfa   : > { %v350_v34 = vrot.slane %v349_v32, 1  ;;  %v362_v35 = vadd.f32 %v361_v33, %v360_v31 }
  0xfc   : > { %v351_v36 = vadd.f32 %v350_v34, %v349_v32  ;;  %v363_v37 = vrot.slane %v362_v35, 1 }
  0xfe   : > { %353 = vst.msk [vmem:[%s238_s24] sm:$0x1] %vm352_vm1, %v351_v36  ;;  %v364_v38 = vadd.f32 %v363_v37, %v362_v35 }
 0x100   : > { %365 = vst.msk [vmem:[%s241_s27] sm:$0x1] %vm352_vm1, %v364_v38 }
 0x101 PF: > { %s16_s18 = sadd.s32 1, %s546_s18  }
 0x102   : > { %p13_p4 = scmp.ge.s32.totalorder %s16_s18, 4  }
 0x104   :  { %15 = sbr.rel (!%p13_p4) target bundleno = 1 (0x1), region = 86 }

// kernel: fpn_forward_pallas.15
= control target key start
LH: loop header
LB: loop body
LE: loop exit
PB: predicated region body
PF: predicated region fallthrough
CT: control target
= control target key end

     0   :  { %8 = vsyncpa [#allocation3], 0  ;;  %s523_s0 = inlined_call_operand.vmem [shape: f32[2,16,64], index: 0, kind: input, shape index: {}]   ;;  %s524_s1 = inlined_call_operand.vmem [shape: f32[1,64], index: 1, kind: input, shape index: {}]   ;;  %s525_s2 = inlined_call_operand.vmem [shape: f32[1,64], index: 2, kind: input, shape index: {}]   ;;  %s526_s3 = inlined_call_operand.hbm [shape: f32[2,16,64], index: 3, kind: output, shape index: {}]  }
   0x1   :  { %10 = vsyncpa [#allocation3 + $0x1], 0  ;;  %s414_s12 = smov 0   ;;  %s416_s13 = smov 0  }
   0x2   :  { %s418_s14 = smov 0   ;;  %s420_s15 = smov 0  }
   0x3 LB: > { %s435_s16 = sadd.s32 4294967295, %s389_s15   ;;  %s270_s17 = sadd.s32 4294967294, %s389_s15   ;;  %s389_s15 = sphi %s420_s15, %s532_s15   ;;  %s385_s14 = sphi %s418_s14, %s531_s14   ;;  %s381_s13 = sphi %s416_s13, %s530_s13   ;;  %s377_s12 = sphi %s414_s12, %s529_s12  }
   0x4   : > { %s439_s18 = sadd.s32 1, %s389_s15   ;;  %s91_s19 = sadd.s32 1, %s385_s14 }
   0x5   : > { %s88_s20 = ssub.s32 %s389_s15, %s439_s18  ;;  %p101_p0 = scmp.ne.s32.totalorder %s385_s14, %s381_s13 }
   0x6   : > { %p89_p1 = scmp.eq.s32.totalorder %s88_s20, 0  ;;  %p102_p2 = scmp.eq.s32.totalorder %s435_s16, 1 }
   0x7   : > { %p107_p3 = scmp.ne.s32.totalorder %s381_s13, %s377_s12  ;;  %p108_p4 = scmp.eq.s32.totalorder %s270_s17, 1 }
   0x8   : > { %s450_s21 = scalar_select %p89_p1, %s385_s14, %s91_s19  }
   0x9   : > { %p452_p5 = por %p102_p2, %p101_p0  ;;  %p456_p6 = por %p108_p4, %p107_p3 }
   0xa   : > { %p273_p7 = scmp.ge.s32.totalorder %s389_s15, 1  ;;  %p140_p8 = scmp.lt.s32.totalorder %s389_s15, 3 }
   0xc   : > { %p141_p9 = pnand %p273_p7, %p140_p8 }
   0xd   : > { %s161_s24 = sand.u32 (!%p141_p9), 1, %s381_s13   ;;  %p164_p10 = scmp.lt.s32.totalorder (!%p141_p9), %s435_s16, 1  ;;  %v277_v0 = vld [vmem:[%s524_s1] ss:$0 sm:$0xff] (!%p141_p9)  ;;  %vm191_vm0 = vcmask (!%p141_p9), 523264  }
   0xe   : > { %144 = sbr.rel (%p141_p9) target bundleno = 47 (0x2f), region = 32  ;;  %s274_s25 = sshll.u32 (!%p141_p9), %s161_s24, 4  ;;  %v278_v2 = vld [vmem:[%s525_s2] ss:$0 sm:$0xff] (!%p141_p9) }
   0xf   : > { %s163_s8 = scalar_lea.vmem (!%p141_p9), [#allocation2], %s274_s25  ;;  %s285_s10 = sshll.u32 (!%p141_p9), %s435_s16, 8 }
  0x10   : > { %s208_s9 = sshll.u32 (!%p141_p9), %s163_s8, 4  ;;  %s480_s19 = scalar_lea.hbm (!%p141_p9), %s526_s3, %s285_s10  ;;  %s475_s9 = int_to_ptr.vmem [resolvable:$true] %s208_s9 }
  0x11   : > { %s482_s20 = scalar_lea.sflag (!%p141_p9), [#allocation3], %s161_s24  ;;  %s391_s25 = smov (!%p141_p9), [#allocation2]  }
  0x15   : > { %s165_s26 = scalar_select %p164_p10, %s435_s16, 1 }
  0x16   : > { %s327_s16 = scalar_lea.vmem %s475_s9, 256 }
  0x17   : > { %s284_s27 = sshll.u32 %s165_s26, 4  ;;  %p328_p11 = scmp.ne.s32.totalorder %s475_s9, %s327_s16 }
  0x18   : > { %s168_s5 = scalar_lea.vmem %s523_s0, %s284_s27  ;;  %s331_s26 = sshll.u32 %s391_s25, 4  ;;  %s332_s26 = int_to_ptr.vmem [resolvable:$false] %s331_s26 }
  0x19   : > { %v169_v1 = vld [vmem:[%s168_s5] sm:$0xff]  ;;  %v170_v3 = vld [vmem:[%s168_s5 + $0x8] sm:$0xff]  ;;  %p329_p12 = pnand %p328_p11, %p452_p5  ;;  %s333_s27 = scalar_lea.vmem %s332_s26, 512 }
  0x1a   : > { %v178_v4 = vmul.f32 %v277_v0, %v169_v1  ;;  %v179_v5 = vmul.f32 %v277_v0, %v170_v3  ;;  %p334_p0 = scmp.lt.s32.totalorder %s475_s9, %s332_s26  ;;  %p335_p1 = scmp.lt.s32.totalorder %s333_s27, %s327_s16 }
  0x1b   : > { %p330_p13 = pneg %p329_p12 }
  0x1c   : > { %v187_v6 = vadd.f32 %v278_v2, %v178_v4  ;;  %v188_v7 = vadd.f32 %v278_v2, %v179_v5  ;;  %p336_p2 = por %p335_p1, %p334_p0 }
  0x1e   : > { %v189_v8 = vmax.f32 %v187_v6, 0.0  ;;  %v190_v9 = vmax.f32 %v188_v7, 0.0  ;;  %p337_p3 = pnand %p336_p2, %p330_p13 }
  0x20   : > { %192 = vst.msk [vmem:[%s163_s8] sm:$0xff] %vm191_vm0, %v189_v8  ;;  %193 = vst.msk [vmem:[%s163_s8 + $0x8] sm:$0xff] %vm191_vm0, %v190_v9 }
  0x21   : > { %340 = shalt.err (!%p337_p3)
}
  0x22   : > { %s341_s24 = scalar_lea.hbm %s480_s19, 256  ;;  %s345_s30 = scalar_lea.hbm %s526_s3, 512 }
  0x23   : > { %p342_p4 = scmp.ne.s32.totalorder %s480_s19, %s341_s24  ;;  %p346_p9 = scmp.lt.u32.totalorder %s480_s19, %s526_s3 }
  0x24   : > { %p347_p10 = scmp.lt.u32.totalorder %s345_s30, %s341_s24  ;;  %p349_p12 = scmp.lt.u32.totalorder %s341_s24, %s480_s19 }
  0x25   : > { %p343_p7 = pnand %p342_p4, %p452_p5 }
  0x26   : > { %p348_p11 = por %p347_p10, %p346_p9 }
  0x27   : > { %p344_p8 = pneg %p343_p7 }
  0x28   : > { %p350_p13 = por %p349_p12, %p348_p11 }
  0x2a   : > { %p351_p0 = pnand %p350_p13, %p344_p8 }
  0x2c   : > { %354 = shalt.err (!%p351_p0)
}
  0x2d   : > { %s392_s6 = smov 128   ;;  %s393_s7 = smov 8  }
  0x2e   : > { %286 = dma.vmem_to_hbm [thread:$0]  (%p452_p5), %s475_s9, 256, %s480_s19, %s482_s20, %s392_s6, %s392_s6, %s393_s7  }
  0x2f PF: > { %p292_p1 = scmp.ge.s32.totalorder %s389_s15, 2  ;;  %s223_s8 = sand.u32 1, %s377_s12  }
  0x30   : > { %s224_s10 = scalar_lea.sflag [#allocation3], %s223_s8 }
  0x31   : > { %p289_p2 = pnand %p292_p1, %p456_p6 }
  0x33   : > { %372 = dma.done.wait (!%p289_p2), %s224_s10, 256  }
  0x34   : > { %374 = vsyncadd (!%p289_p2), %s224_s10, 4294967040  ;;  %p13_p3 = scmp.ge.s32.totalorder %s439_s18, 4   ;;  %s529_s12 = smov %s381_s13 }
  0x35   : > { %s530_s13 = smov %s385_s14  ;;  %s531_s14 = smov %s450_s21 }
  0x36   : > { %s532_s15 = smov %s439_s18  ;;  %15 = sbr.rel (!%p13_p3) target bundleno = 3 (0x3), region = 67 }
  0x3d   :  { %229 = vsyncpa [#allocation3], 1 }
  0x3e   :  { %231 = vsyncpa [#allocation3 + $0x1], 1 }

</bundles_post_ra>
